<compile_context>
chip_gen: v7x
topology: tpu7x:2x2x1
jax: 0.10.0
libtpu: 0.0.40
codegen_flags: <defaults>
</compile_context>

<pallas_src>
import functools

import jax
import jax.numpy as jnp
from jax import lax
from jax.experimental import pallas as pl
from jax.experimental.pallas import tpu as pltpu


def _make_head_kernel(block_b, H, W, C_in, C1, C2, nC):
    """Builds the fused conv->relu->conv->relu->maxpool->linear kernel."""
    H1, W1 = H - 2, W - 2          # after totunecnn1 (3x3, valid)
    H2, W2 = H1 - 2, W1 - 2        # after totunecnn2 (3x3, valid)
    # MaxPool2d(3) (stride 3, floor) must yield 1x1 so flatten gives C2 features
    # matching nn.Linear(8, nClasses).
    assert 3 <= H2 <= 5 and 3 <= W2 <= 5, "head requires a 7x7..9x9 feature map"

    HW = H * W
    PK = 3                              # pool window (MaxPool2d(3))
    # "Wide frame": conv outputs are kept at the ORIGINAL width-stride W, so every
    # conv tap (dh, dw) is a single contiguous slice at row-offset dh*W + dw.
    # Rows whose (row % W) exceeds the valid output width are junk and never read.
    R2 = (PK - 1) * W + PK              # conv2 rows needed to cover the 3x3 pool window
    R1 = (R2 - 1) + (2 * W + 2) + 1     # conv1 rows needed to cover those conv2 rows
    assert (2 * W + 2) + R1 <= HW       # conv1 tap-combine never crosses an image boundary
    pool_rows = [oh * W + ow for oh in range(PK) for ow in range(PK)]

    def kernel(x_ref, w1_ref, w2_ref, w3_ref, b3_ref, o_ref):
        # ---- totunecnn1: ONE fused MXU push for the whole batch block ----
        # x_ref[0]: (block_b*HW, C_in) bf16 ; w1_ref: (C_in, 9*C1) bf16 (tap-major cols)
        P = jnp.dot(x_ref[0], w1_ref[...],
                    preferred_element_type=jnp.float32)        # (block_b*HW, 9*C1) f32

        w2v = w2_ref[...]                                      # (C1, 9*C2) f32
        w3v = w3_ref[...]                                      # (C2, nC)   f32
        b3v = b3_ref[...]                                      # (1, nC)    f32

        for b in range(block_b):                               # small static unroll
            base = b * HW

            # -- conv1 tap-combine (+ReLU): 8 VPU adds over shifted/sliced views of P --
            y1 = None
            for dh in range(3):
                for dw in range(3):
                    tap = dh * 3 + dw
                    off = dh * W + dw
                    piece = P[base + off: base + off + R1,
                              tap * C1:(tap + 1) * C1]          # (R1, C1)
                    y1 = piece if y1 is None else y1 + piece
            y1 = jnp.maximum(y1, 0.0)                           # ReLU (junk cols unused)

            # -- totunecnn2: ONE tiny MXU push + tap-combine (+ReLU) --
            Q = jnp.dot(y1, w2v,
                        preferred_element_type=jnp.float32)     # (R1, 9*C2)
            y2 = None
            for dh in range(3):
                for dw in range(3):
                    tap = dh * 3 + dw
                    off = dh * W + dw
                    piece = Q[off: off + R2,
                              tap * C2:(tap + 1) * C2]          # (R2, C2)
                    y2 = piece if y2 is None else y2 + piece
            y2 = jnp.maximum(y2, 0.0)

            # -- MaxPool2d(3) (stride 3, floor -> single top-left 3x3 window) --
            pooled = y2[pool_rows[0]: pool_rows[0] + 1, :]      # (1, C2)
            for r in pool_rows[1:]:
                pooled = jnp.maximum(pooled, y2[r: r + 1, :])

            # -- flatten + totunelin6 on the VPU: C2 broadcast multiply-adds, no MXU --
            out_b = b3v
            for c in range(C2):
                out_b = out_b + pooled[:, c: c + 1] * w3v[c: c + 1, :]   # (1, nC)
            o_ref[0, pl.ds(b, 1), :] = out_b

    return kernel


@functools.partial(jax.jit, static_argnames=("block_b",))
def classifier_head(x_nchw, w1_oihw, w2_oihw, w3, b3, *, block_b=None):
    """Pallas implementation of the ClassifierForULite head.

    x_nchw:  (N, 512, H, W) float32  -- e5 encoder feature map (NCHW)
    w1_oihw: (16, 512, 3, 3)         -- totunecnn1 weight (OIHW, no bias)
    w2_oihw: (8, 16, 3, 3)           -- totunecnn2 weight (OIHW, no bias)
    w3:      (nClasses, 8)           -- totunelin6 weight
    b3:      (nClasses,)             -- totunelin6 bias
    returns  (N, nClasses) float32
    """
    N, C_in, H, W = x_nchw.shape
    C1 = w1_oihw.shape[0]
    C2 = w2_oihw.shape[0]
    nC = w3.shape[0]

    if block_b is None:
        # Fold several images into the matmul M dimension (block_b*H*W rows per push)
        # while keeping a "parallel" batch-chunk grid axis for v7x's two TensorCores.
        block_b = max(1, min(8, N))
    G = pl.cdiv(N, block_b)
    Npad = G * block_b

    # Glue: layout plumbing only (see `# layout:` at top of file).
    x = jnp.transpose(x_nchw, (0, 2, 3, 1)).reshape(N, H * W, C_in)
    if Npad != N:
        x = jnp.pad(x, ((0, Npad - N), (0, 0), (0, 0)))
    x = x.reshape(G, block_b * H * W, C_in).astype(jnp.bfloat16)   # bf16 halves the DMA

    # Conv weights -> lane-dense (C_in, 9*C_out), columns ordered tap*C_out + c_out.
    w1 = jnp.transpose(w1_oihw, (2, 3, 1, 0)).reshape(9, C_in, C1)
    w1 = jnp.transpose(w1, (1, 0, 2)).reshape(C_in, 9 * C1).astype(jnp.bfloat16)
    w2 = jnp.transpose(w2_oihw, (2, 3, 1, 0)).reshape(9, C1, C2)
    w2 = jnp.transpose(w2, (1, 0, 2)).reshape(C1, 9 * C2).astype(jnp.float32)
    w3t = jnp.transpose(w3, (1, 0)).astype(jnp.float32)            # (C2, nC)
    b3r = b3.reshape(1, nC).astype(jnp.float32)

    kernel = _make_head_kernel(block_b, H, W, C_in, C1, C2, nC)

    out = pl.pallas_call(
        kernel,
        out_shape=jax.ShapeDtypeStruct((G, block_b, nC), jnp.float32),
        grid=(G,),
        in_specs=[
            pl.BlockSpec((1, block_b * H * W, C_in), lambda g: (g, 0, 0)),  # x batch-chunk
            pl.BlockSpec((C_in, 9 * C1), lambda g: (0, 0)),   # conv1 weights (lane dense)
            pl.BlockSpec((C1, 9 * C2), lambda g: (0, 0)),     # conv2 weights (lane dense)
            pl.BlockSpec((C2, nC), lambda g: (0, 0)),         # linear weight^T
            pl.BlockSpec((1, nC), lambda g: (0, 0)),          # linear bias
        ],
        out_specs=pl.BlockSpec((1, block_b, nC), lambda g: (g, 0, 0)),
        compiler_params=pltpu.CompilerParams(
            dimension_semantics=("parallel",)),
    )(x, w1, w2, w3t, b3r)

    return out.reshape(Npad, nC)[:N]


def _reference(x_nchw, w1, w2, w3, b3, *, conv1_bf16=False):
    """Pure-JAX reference mirroring the PyTorch forward (for verification)."""
    dn = ("NCHW", "OIHW", "NCHW")
    hp = lax.Precision.HIGHEST
    xx, ww1 = x_nchw, w1
    if conv1_bf16:  # mirrors the kernel's bf16-input / f32-accumulate conv1
        xx, ww1 = xx.astype(jnp.bfloat16), ww1.astype(jnp.bfloat16)
    y = lax.conv_general_dilated(xx, ww1, (1, 1), "VALID", dimension_numbers=dn,
                                 preferred_element_type=jnp.float32, precision=hp)
    y = jnp.maximum(y, 0.0)
    y = lax.conv_general_dilated(y, w2, (1, 1), "VALID", dimension_numbers=dn,
                                 preferred_element_type=jnp.float32, precision=hp)
    y = jnp.maximum(y, 0.0)
    y = lax.reduce_window(y, -jnp.inf, lax.max,
                          (1, 1, 3, 3), (1, 1, 3, 3), "VALID")   # MaxPool2d(3)
    y = y.reshape(y.shape[0], -1)                                 # flatten(start_dim=1)
    return jnp.dot(y, w3.T, precision=hp) + b3                    # Linear(8, nClasses)


if __name__ == "__main__":
    key = jax.random.PRNGKey(0)
    k_x, k_w1, k_w2, k_w3, k_b3 = jax.random.split(key, 5)

    N, C_feat, H, W = 2, 512, 7, 7      # e5 feature map (e.g. 224x224 input / 32)
    nClasses = 10

    # Synthetic, deterministic parameters (shapes from the module __init__).
    x = jax.random.normal(k_x, (N, C_feat, H, W), jnp.float32)
    w1 = jax.random.normal(k_w1, (16, 512, 3, 3), jnp.float32) * 0.02   # totunecnn1
    w2 = jax.random.normal(k_w2, (8, 16, 3, 3), jnp.float32) * 0.10     # totunecnn2
    w3 = jax.random.normal(k_w3, (nClasses, 8), jnp.float32) * 0.30     # totunelin6.weight
    b3 = jax.random.normal(k_b3, (nClasses,), jnp.float32) * 0.10       # totunelin6.bias

    out = jax.block_until_ready(classifier_head(x, w1, w2, w3, b3))
    assert out.shape == (N, nClasses)

    # Tight check against a reference that matches the kernel's mixed precision
    # (bf16 conv1 inputs, f32 accumulate everywhere), plus a loose check against
    # the pure-f32 PyTorch-semantics reference.
    ref_mixed = _reference(x, w1, w2, w3, b3, conv1_bf16=True)
    ref_f32 = _reference(x, w1, w2, w3, b3, conv1_bf16=False)
    assert jnp.allclose(out, ref_mixed, atol=1e-2, rtol=1e-2), (out, ref_mixed)
    assert jnp.allclose(out, ref_f32, atol=1e-1, rtol=1e-1), (out, ref_f32)

    print("KERNEL_OK")
</pallas_src>

<mosaic_0001>
module attributes {stable_mosaic.version = 11 : i64} {
  func.func @kernel(%arg0: i32, %arg1: memref<1x98x512xbf16, #tpu.memory_space<vmem>>, %arg2: memref<512x144xbf16, #tpu.memory_space<vmem>>, %arg3: memref<16x72xf32, #tpu.memory_space<vmem>>, %arg4: memref<8x10xf32, #tpu.memory_space<vmem>>, %arg5: memref<1x10xf32, #tpu.memory_space<vmem>>, %arg6: memref<1x2x10xf32, #tpu.memory_space<vmem>>) attributes {dimension_semantics = [#tpu.dimension_semantics<parallel>], iteration_bounds = array<i64: 1>, scalar_prefetch = 0 : i64, scratch_operands = 0 : i64, tpu.core_type = #tpu.core_type<tc>, window_params = [{transform_indices = @transform_0, window_bounds = array<i64: 1, 98, 512>}, {pipeline_mode = #tpu.pipeline_mode<synchronous>, transform_indices = @transform_1, window_bounds = array<i64: 512, 144>}, {pipeline_mode = #tpu.pipeline_mode<synchronous>, transform_indices = @transform_2, window_bounds = array<i64: 16, 72>}, {pipeline_mode = #tpu.pipeline_mode<synchronous>, transform_indices = @transform_3, window_bounds = array<i64: 8, 10>}, {pipeline_mode = #tpu.pipeline_mode<synchronous>, transform_indices = @transform_4, window_bounds = array<i64: 1, 10>}, {transform_indices = @transform_5, window_bounds = array<i64: 1, 2, 10>}]} {
    %c0 = arith.constant 0 : index
    %c0_0 = arith.constant 0 : index
    %c0_1 = arith.constant 0 : index
    %0 = vector.load %arg1[%c0, %c0_0, %c0_1] : memref<1x98x512xbf16, #tpu.memory_space<vmem>>, vector<1x98x512xbf16>
    %1 = vector.shape_cast %0 : vector<1x98x512xbf16> to vector<98x512xbf16>
    %c0_2 = arith.constant 0 : index
    %c0_3 = arith.constant 0 : index
    %2 = vector.load %arg2[%c0_2, %c0_3] : memref<512x144xbf16, #tpu.memory_space<vmem>>, vector<512x144xbf16>
    %cst = arith.constant dense<0.000000e+00> : vector<98x144xf32>
    %3 = tpu.matmul %1, %2, %cst {dimension_numbers = #tpu.dot_dimension_numbers<[1], [0], [0], [1], [0, 0, 1, 1], [], []>} : vector<98x512xbf16>, vector<512x144xbf16>, vector<98x144xf32> -> vector<98x144xf32>
    %c0_4 = arith.constant 0 : index
    %c0_5 = arith.constant 0 : index
    %4 = vector.load %arg3[%c0_4, %c0_5] : memref<16x72xf32, #tpu.memory_space<vmem>>, vector<16x72xf32>
    %c0_6 = arith.constant 0 : index
    %c0_7 = arith.constant 0 : index
    %5 = vector.load %arg4[%c0_6, %c0_7] : memref<8x10xf32, #tpu.memory_space<vmem>>, vector<8x10xf32>
    %c0_8 = arith.constant 0 : index
    %c0_9 = arith.constant 0 : index
    %6 = vector.load %arg5[%c0_8, %c0_9] : memref<1x10xf32, #tpu.memory_space<vmem>>, vector<1x10xf32>
    %7 = vector.extract_strided_slice %3 {offsets = [0, 0], sizes = [33, 16], strides = [1, 1]} : vector<98x144xf32> to vector<33x16xf32>
    %8 = vector.extract_strided_slice %3 {offsets = [1, 16], sizes = [33, 16], strides = [1, 1]} : vector<98x144xf32> to vector<33x16xf32>
    %9 = arith.addf %7, %8 : vector<33x16xf32>
    %10 = vector.extract_strided_slice %3 {offsets = [2, 32], sizes = [33, 16], strides = [1, 1]} : vector<98x144xf32> to vector<33x16xf32>
    %11 = arith.addf %9, %10 : vector<33x16xf32>
    %12 = vector.extract_strided_slice %3 {offsets = [7, 48], sizes = [33, 16], strides = [1, 1]} : vector<98x144xf32> to vector<33x16xf32>
    %13 = arith.addf %11, %12 : vector<33x16xf32>
    %14 = vector.extract_strided_slice %3 {offsets = [8, 64], sizes = [33, 16], strides = [1, 1]} : vector<98x144xf32> to vector<33x16xf32>
    %15 = arith.addf %13, %14 : vector<33x16xf32>
    %16 = vector.extract_strided_slice %3 {offsets = [9, 80], sizes = [33, 16], strides = [1, 1]} : vector<98x144xf32> to vector<33x16xf32>
    %17 = arith.addf %15, %16 : vector<33x16xf32>
    %18 = vector.extract_strided_slice %3 {offsets = [14, 96], sizes = [33, 16], strides = [1, 1]} : vector<98x144xf32> to vector<33x16xf32>
    %19 = arith.addf %17, %18 : vector<33x16xf32>
    %20 = vector.extract_strided_slice %3 {offsets = [15, 112], sizes = [33, 16], strides = [1, 1]} : vector<98x144xf32> to vector<33x16xf32>
    %21 = arith.addf %19, %20 : vector<33x16xf32>
    %22 = vector.extract_strided_slice %3 {offsets = [16, 128], sizes = [33, 16], strides = [1, 1]} : vector<98x144xf32> to vector<33x16xf32>
    %23 = arith.addf %21, %22 : vector<33x16xf32>
    %cst_10 = arith.constant 0.000000e+00 : f32
    %24 = vector.broadcast %cst_10 : f32 to vector<33x16xf32>
    %25 = arith.maximumf %23, %24 : vector<33x16xf32>
    %cst_11 = arith.constant dense<0.000000e+00> : vector<33x72xf32>
    %26 = tpu.matmul %25, %4, %cst_11 {dimension_numbers = #tpu.dot_dimension_numbers<[1], [0], [0], [1], [0, 0, 1, 1], [], []>} : vector<33x16xf32>, vector<16x72xf32>, vector<33x72xf32> -> vector<33x72xf32>
    %27 = vector.extract_strided_slice %26 {offsets = [0, 0], sizes = [17, 8], strides = [1, 1]} : vector<33x72xf32> to vector<17x8xf32>
    %28 = vector.extract_strided_slice %26 {offsets = [1, 8], sizes = [17, 8], strides = [1, 1]} : vector<33x72xf32> to vector<17x8xf32>
    %29 = arith.addf %27, %28 : vector<17x8xf32>
    %30 = vector.extract_strided_slice %26 {offsets = [2, 16], sizes = [17, 8], strides = [1, 1]} : vector<33x72xf32> to vector<17x8xf32>
    %31 = arith.addf %29, %30 : vector<17x8xf32>
    %32 = vector.extract_strided_slice %26 {offsets = [7, 24], sizes = [17, 8], strides = [1, 1]} : vector<33x72xf32> to vector<17x8xf32>
    %33 = arith.addf %31, %32 : vector<17x8xf32>
    %34 = vector.extract_strided_slice %26 {offsets = [8, 32], sizes = [17, 8], strides = [1, 1]} : vector<33x72xf32> to vector<17x8xf32>
    %35 = arith.addf %33, %34 : vector<17x8xf32>
    %36 = vector.extract_strided_slice %26 {offsets = [9, 40], sizes = [17, 8], strides = [1, 1]} : vector<33x72xf32> to vector<17x8xf32>
    %37 = arith.addf %35, %36 : vector<17x8xf32>
    %38 = vector.extract_strided_slice %26 {offsets = [14, 48], sizes = [17, 8], strides = [1, 1]} : vector<33x72xf32> to vector<17x8xf32>
    %39 = arith.addf %37, %38 : vector<17x8xf32>
    %40 = vector.extract_strided_slice %26 {offsets = [15, 56], sizes = [17, 8], strides = [1, 1]} : vector<33x72xf32> to vector<17x8xf32>
    %41 = arith.addf %39, %40 : vector<17x8xf32>
    %42 = vector.extract_strided_slice %26 {offsets = [16, 64], sizes = [17, 8], strides = [1, 1]} : vector<33x72xf32> to vector<17x8xf32>
    %43 = arith.addf %41, %42 : vector<17x8xf32>
    %cst_12 = arith.constant 0.000000e+00 : f32
    %44 = vector.broadcast %cst_12 : f32 to vector<17x8xf32>
    %45 = arith.maximumf %43, %44 : vector<17x8xf32>
    %46 = vector.extract_strided_slice %45 {offsets = [0, 0], sizes = [1, 8], strides = [1, 1]} : vector<17x8xf32> to vector<1x8xf32>
    %47 = vector.extract_strided_slice %45 {offsets = [1, 0], sizes = [1, 8], strides = [1, 1]} : vector<17x8xf32> to vector<1x8xf32>
    %48 = arith.maximumf %46, %47 : vector<1x8xf32>
    %49 = vector.extract_strided_slice %45 {offsets = [2, 0], sizes = [1, 8], strides = [1, 1]} : vector<17x8xf32> to vector<1x8xf32>
    %50 = arith.maximumf %48, %49 : vector<1x8xf32>
    %51 = vector.extract_strided_slice %45 {offsets = [7, 0], sizes = [1, 8], strides = [1, 1]} : vector<17x8xf32> to vector<1x8xf32>
    %52 = arith.maximumf %50, %51 : vector<1x8xf32>
    %53 = vector.extract_strided_slice %45 {offsets = [8, 0], sizes = [1, 8], strides = [1, 1]} : vector<17x8xf32> to vector<1x8xf32>
    %54 = arith.maximumf %52, %53 : vector<1x8xf32>
    %55 = vector.extract_strided_slice %45 {offsets = [9, 0], sizes = [1, 8], strides = [1, 1]} : vector<17x8xf32> to vector<1x8xf32>
    %56 = arith.maximumf %54, %55 : vector<1x8xf32>
    %57 = vector.extract_strided_slice %45 {offsets = [14, 0], sizes = [1, 8], strides = [1, 1]} : vector<17x8xf32> to vector<1x8xf32>
    %58 = arith.maximumf %56, %57 : vector<1x8xf32>
    %59 = vector.extract_strided_slice %45 {offsets = [15, 0], sizes = [1, 8], strides = [1, 1]} : vector<17x8xf32> to vector<1x8xf32>
    %60 = arith.maximumf %58, %59 : vector<1x8xf32>
    %61 = vector.extract_strided_slice %45 {offsets = [16, 0], sizes = [1, 8], strides = [1, 1]} : vector<17x8xf32> to vector<1x8xf32>
    %62 = arith.maximumf %60, %61 : vector<1x8xf32>
    %63 = vector.extract_strided_slice %62 {offsets = [0, 0], sizes = [1, 1], strides = [1, 1]} : vector<1x8xf32> to vector<1x1xf32>
    %64 = vector.extract_strided_slice %5 {offsets = [0, 0], sizes = [1, 10], strides = [1, 1]} : vector<8x10xf32> to vector<1x10xf32>
    %65 = vector.broadcast %63 : vector<1x1xf32> to vector<1x10xf32>
    %66 = arith.mulf %65, %64 : vector<1x10xf32>
    %67 = arith.addf %6, %66 : vector<1x10xf32>
    %68 = vector.extract_strided_slice %62 {offsets = [0, 1], sizes = [1, 1], strides = [1, 1]} : vector<1x8xf32> to vector<1x1xf32>
    %69 = vector.extract_strided_slice %5 {offsets = [1, 0], sizes = [1, 10], strides = [1, 1]} : vector<8x10xf32> to vector<1x10xf32>
    %70 = vector.broadcast %68 : vector<1x1xf32> to vector<1x10xf32>
    %71 = arith.mulf %70, %69 : vector<1x10xf32>
    %72 = arith.addf %67, %71 : vector<1x10xf32>
    %73 = vector.extract_strided_slice %62 {offsets = [0, 2], sizes = [1, 1], strides = [1, 1]} : vector<1x8xf32> to vector<1x1xf32>
    %74 = vector.extract_strided_slice %5 {offsets = [2, 0], sizes = [1, 10], strides = [1, 1]} : vector<8x10xf32> to vector<1x10xf32>
    %75 = vector.broadcast %73 : vector<1x1xf32> to vector<1x10xf32>
    %76 = arith.mulf %75, %74 : vector<1x10xf32>
    %77 = arith.addf %72, %76 : vector<1x10xf32>
    %78 = vector.extract_strided_slice %62 {offsets = [0, 3], sizes = [1, 1], strides = [1, 1]} : vector<1x8xf32> to vector<1x1xf32>
    %79 = vector.extract_strided_slice %5 {offsets = [3, 0], sizes = [1, 10], strides = [1, 1]} : vector<8x10xf32> to vector<1x10xf32>
    %80 = vector.broadcast %78 : vector<1x1xf32> to vector<1x10xf32>
    %81 = arith.mulf %80, %79 : vector<1x10xf32>
    %82 = arith.addf %77, %81 : vector<1x10xf32>
    %83 = vector.extract_strided_slice %62 {offsets = [0, 4], sizes = [1, 1], strides = [1, 1]} : vector<1x8xf32> to vector<1x1xf32>
    %84 = vector.extract_strided_slice %5 {offsets = [4, 0], sizes = [1, 10], strides = [1, 1]} : vector<8x10xf32> to vector<1x10xf32>
    %85 = vector.broadcast %83 : vector<1x1xf32> to vector<1x10xf32>
    %86 = arith.mulf %85, %84 : vector<1x10xf32>
    %87 = arith.addf %82, %86 : vector<1x10xf32>
    %88 = vector.extract_strided_slice %62 {offsets = [0, 5], sizes = [1, 1], strides = [1, 1]} : vector<1x8xf32> to vector<1x1xf32>
    %89 = vector.extract_strided_slice %5 {offsets = [5, 0], sizes = [1, 10], strides = [1, 1]} : vector<8x10xf32> to vector<1x10xf32>
    %90 = vector.broadcast %88 : vector<1x1xf32> to vector<1x10xf32>
    %91 = arith.mulf %90, %89 : vector<1x10xf32>
    %92 = arith.addf %87, %91 : vector<1x10xf32>
    %93 = vector.extract_strided_slice %62 {offsets = [0, 6], sizes = [1, 1], strides = [1, 1]} : vector<1x8xf32> to vector<1x1xf32>
    %94 = vector.extract_strided_slice %5 {offsets = [6, 0], sizes = [1, 10], strides = [1, 1]} : vector<8x10xf32> to vector<1x10xf32>
    %95 = vector.broadcast %93 : vector<1x1xf32> to vector<1x10xf32>
    %96 = arith.mulf %95, %94 : vector<1x10xf32>
    %97 = arith.addf %92, %96 : vector<1x10xf32>
    %98 = vector.extract_strided_slice %62 {offsets = [0, 7], sizes = [1, 1], strides = [1, 1]} : vector<1x8xf32> to vector<1x1xf32>
    %99 = vector.extract_strided_slice %5 {offsets = [7, 0], sizes = [1, 10], strides = [1, 1]} : vector<8x10xf32> to vector<1x10xf32>
    %100 = vector.broadcast %98 : vector<1x1xf32> to vector<1x10xf32>
    %101 = arith.mulf %100, %99 : vector<1x10xf32>
    %102 = arith.addf %97, %101 : vector<1x10xf32>
    %c0_13 = arith.constant 0 : index
    %c0_14 = arith.constant 0 : index
    %c0_15 = arith.constant 0 : index
    %103 = vector.load %arg6[%c0_13, %c0_14, %c0_15] : memref<1x2x10xf32, #tpu.memory_space<vmem>>, vector<1x1x10xf32>
    %104 = vector.shape_cast %103 : vector<1x1x10xf32> to vector<1x10xf32>
    %105 = vector.shape_cast %102 : vector<1x10xf32> to vector<1x1x10xf32>
    tpu.vector_store %arg6[%c0_13, %c0_14, %c0_15], %105 {strides = array<i32>} : memref<1x2x10xf32, #tpu.memory_space<vmem>>, vector<1x1x10xf32>,
    %106 = vector.extract_strided_slice %3 {offsets = [49, 0], sizes = [33, 16], strides = [1, 1]} : vector<98x144xf32> to vector<33x16xf32>
    %107 = vector.extract_strided_slice %3 {offsets = [50, 16], sizes = [33, 16], strides = [1, 1]} : vector<98x144xf32> to vector<33x16xf32>
    %108 = arith.addf %106, %107 : vector<33x16xf32>
    %109 = vector.extract_strided_slice %3 {offsets = [51, 32], sizes = [33, 16], strides = [1, 1]} : vector<98x144xf32> to vector<33x16xf32>
    %110 = arith.addf %108, %109 : vector<33x16xf32>
    %111 = vector.extract_strided_slice %3 {offsets = [56, 48], sizes = [33, 16], strides = [1, 1]} : vector<98x144xf32> to vector<33x16xf32>
    %112 = arith.addf %110, %111 : vector<33x16xf32>
    %113 = vector.extract_strided_slice %3 {offsets = [57, 64], sizes = [33, 16], strides = [1, 1]} : vector<98x144xf32> to vector<33x16xf32>
    %114 = arith.addf %112, %113 : vector<33x16xf32>
    %115 = vector.extract_strided_slice %3 {offsets = [58, 80], sizes = [33, 16], strides = [1, 1]} : vector<98x144xf32> to vector<33x16xf32>
    %116 = arith.addf %114, %115 : vector<33x16xf32>
    %117 = vector.extract_strided_slice %3 {offsets = [63, 96], sizes = [33, 16], strides = [1, 1]} : vector<98x144xf32> to vector<33x16xf32>
    %118 = arith.addf %116, %117 : vector<33x16xf32>
    %119 = vector.extract_strided_slice %3 {offsets = [64, 112], sizes = [33, 16], strides = [1, 1]} : vector<98x144xf32> to vector<33x16xf32>
    %120 = arith.addf %118, %119 : vector<33x16xf32>
    %121 = vector.extract_strided_slice %3 {offsets = [65, 128], sizes = [33, 16], strides = [1, 1]} : vector<98x144xf32> to vector<33x16xf32>
    %122 = arith.addf %120, %121 : vector<33x16xf32>
    %cst_16 = arith.constant 0.000000e+00 : f32
    %123 = vector.broadcast %cst_16 : f32 to vector<33x16xf32>
    %124 = arith.maximumf %122, %123 : vector<33x16xf32>
    %cst_17 = arith.constant dense<0.000000e+00> : vector<33x72xf32>
    %125 = tpu.matmul %124, %4, %cst_17 {dimension_numbers = #tpu.dot_dimension_numbers<[1], [0], [0], [1], [0, 0, 1, 1], [], []>} : vector<33x16xf32>, vector<16x72xf32>, vector<33x72xf32> -> vector<33x72xf32>
    %126 = vector.extract_strided_slice %125 {offsets = [0, 0], sizes = [17, 8], strides = [1, 1]} : vector<33x72xf32> to vector<17x8xf32>
    %127 = vector.extract_strided_slice %125 {offsets = [1, 8], sizes = [17, 8], strides = [1, 1]} : vector<33x72xf32> to vector<17x8xf32>
    %128 = arith.addf %126, %127 : vector<17x8xf32>
    %129 = vector.extract_strided_slice %125 {offsets = [2, 16], sizes = [17, 8], strides = [1, 1]} : vector<33x72xf32> to vector<17x8xf32>
    %130 = arith.addf %128, %129 : vector<17x8xf32>
    %131 = vector.extract_strided_slice %125 {offsets = [7, 24], sizes = [17, 8], strides = [1, 1]} : vector<33x72xf32> to vector<17x8xf32>
    %132 = arith.addf %130, %131 : vector<17x8xf32>
    %133 = vector.extract_strided_slice %125 {offsets = [8, 32], sizes = [17, 8], strides = [1, 1]} : vector<33x72xf32> to vector<17x8xf32>
    %134 = arith.addf %132, %133 : vector<17x8xf32>
    %135 = vector.extract_strided_slice %125 {offsets = [9, 40], sizes = [17, 8], strides = [1, 1]} : vector<33x72xf32> to vector<17x8xf32>
    %136 = arith.addf %134, %135 : vector<17x8xf32>
    %137 = vector.extract_strided_slice %125 {offsets = [14, 48], sizes = [17, 8], strides = [1, 1]} : vector<33x72xf32> to vector<17x8xf32>
    %138 = arith.addf %136, %137 : vector<17x8xf32>
    %139 = vector.extract_strided_slice %125 {offsets = [15, 56], sizes = [17, 8], strides = [1, 1]} : vector<33x72xf32> to vector<17x8xf32>
    %140 = arith.addf %138, %139 : vector<17x8xf32>
    %141 = vector.extract_strided_slice %125 {offsets = [16, 64], sizes = [17, 8], strides = [1, 1]} : vector<33x72xf32> to vector<17x8xf32>
    %142 = arith.addf %140, %141 : vector<17x8xf32>
    %cst_18 = arith.constant 0.000000e+00 : f32
    %143 = vector.broadcast %cst_18 : f32 to vector<17x8xf32>
    %144 = arith.maximumf %142, %143 : vector<17x8xf32>
    %145 = vector.extract_strided_slice %144 {offsets = [0, 0], sizes = [1, 8], strides = [1, 1]} : vector<17x8xf32> to vector<1x8xf32>
    %146 = vector.extract_strided_slice %144 {offsets = [1, 0], sizes = [1, 8], strides = [1, 1]} : vector<17x8xf32> to vector<1x8xf32>
    %147 = arith.maximumf %145, %146 : vector<1x8xf32>
    %148 = vector.extract_strided_slice %144 {offsets = [2, 0], sizes = [1, 8], strides = [1, 1]} : vector<17x8xf32> to vector<1x8xf32>
    %149 = arith.maximumf %147, %148 : vector<1x8xf32>
    %150 = vector.extract_strided_slice %144 {offsets = [7, 0], sizes = [1, 8], strides = [1, 1]} : vector<17x8xf32> to vector<1x8xf32>
    %151 = arith.maximumf %149, %150 : vector<1x8xf32>
    %152 = vector.extract_strided_slice %144 {offsets = [8, 0], sizes = [1, 8], strides = [1, 1]} : vector<17x8xf32> to vector<1x8xf32>
    %153 = arith.maximumf %151, %152 : vector<1x8xf32>
    %154 = vector.extract_strided_slice %144 {offsets = [9, 0], sizes = [1, 8], strides = [1, 1]} : vector<17x8xf32> to vector<1x8xf32>
    %155 = arith.maximumf %153, %154 : vector<1x8xf32>
    %156 = vector.extract_strided_slice %144 {offsets = [14, 0], sizes = [1, 8], strides = [1, 1]} : vector<17x8xf32> to vector<1x8xf32>
    %157 = arith.maximumf %155, %156 : vector<1x8xf32>
    %158 = vector.extract_strided_slice %144 {offsets = [15, 0], sizes = [1, 8], strides = [1, 1]} : vector<17x8xf32> to vector<1x8xf32>
    %159 = arith.maximumf %157, %158 : vector<1x8xf32>
    %160 = vector.extract_strided_slice %144 {offsets = [16, 0], sizes = [1, 8], strides = [1, 1]} : vector<17x8xf32> to vector<1x8xf32>
    %161 = arith.maximumf %159, %160 : vector<1x8xf32>
    %162 = vector.extract_strided_slice %161 {offsets = [0, 0], sizes = [1, 1], strides = [1, 1]} : vector<1x8xf32> to vector<1x1xf32>
    %163 = vector.extract_strided_slice %5 {offsets = [0, 0], sizes = [1, 10], strides = [1, 1]} : vector<8x10xf32> to vector<1x10xf32>
    %164 = vector.broadcast %162 : vector<1x1xf32> to vector<1x10xf32>
    %165 = arith.mulf %164, %163 : vector<1x10xf32>
    %166 = arith.addf %6, %165 : vector<1x10xf32>
    %167 = vector.extract_strided_slice %161 {offsets = [0, 1], sizes = [1, 1], strides = [1, 1]} : vector<1x8xf32> to vector<1x1xf32>
    %168 = vector.extract_strided_slice %5 {offsets = [1, 0], sizes = [1, 10], strides = [1, 1]} : vector<8x10xf32> to vector<1x10xf32>
    %169 = vector.broadcast %167 : vector<1x1xf32> to vector<1x10xf32>
    %170 = arith.mulf %169, %168 : vector<1x10xf32>
    %171 = arith.addf %166, %170 : vector<1x10xf32>
    %172 = vector.extract_strided_slice %161 {offsets = [0, 2], sizes = [1, 1], strides = [1, 1]} : vector<1x8xf32> to vector<1x1xf32>
    %173 = vector.extract_strided_slice %5 {offsets = [2, 0], sizes = [1, 10], strides = [1, 1]} : vector<8x10xf32> to vector<1x10xf32>
    %174 = vector.broadcast %172 : vector<1x1xf32> to vector<1x10xf32>
    %175 = arith.mulf %174, %173 : vector<1x10xf32>
    %176 = arith.addf %171, %175 : vector<1x10xf32>
    %177 = vector.extract_strided_slice %161 {offsets = [0, 3], sizes = [1, 1], strides = [1, 1]} : vector<1x8xf32> to vector<1x1xf32>
    %178 = vector.extract_strided_slice %5 {offsets = [3, 0], sizes = [1, 10], strides = [1, 1]} : vector<8x10xf32> to vector<1x10xf32>
    %179 = vector.broadcast %177 : vector<1x1xf32> to vector<1x10xf32>
    %180 = arith.mulf %179, %178 : vector<1x10xf32>
    %181 = arith.addf %176, %180 : vector<1x10xf32>
    %182 = vector.extract_strided_slice %161 {offsets = [0, 4], sizes = [1, 1], strides = [1, 1]} : vector<1x8xf32> to vector<1x1xf32>
    %183 = vector.extract_strided_slice %5 {offsets = [4, 0], sizes = [1, 10], strides = [1, 1]} : vector<8x10xf32> to vector<1x10xf32>
    %184 = vector.broadcast %182 : vector<1x1xf32> to vector<1x10xf32>
    %185 = arith.mulf %184, %183 : vector<1x10xf32>
    %186 = arith.addf %181, %185 : vector<1x10xf32>
    %187 = vector.extract_strided_slice %161 {offsets = [0, 5], sizes = [1, 1], strides = [1, 1]} : vector<1x8xf32> to vector<1x1xf32>
    %188 = vector.extract_strided_slice %5 {offsets = [5, 0], sizes = [1, 10], strides = [1, 1]} : vector<8x10xf32> to vector<1x10xf32>
    %189 = vector.broadcast %187 : vector<1x1xf32> to vector<1x10xf32>
    %190 = arith.mulf %189, %188 : vector<1x10xf32>
    %191 = arith.addf %186, %190 : vector<1x10xf32>
    %192 = vector.extract_strided_slice %161 {offsets = [0, 6], sizes = [1, 1], strides = [1, 1]} : vector<1x8xf32> to vector<1x1xf32>
    %193 = vector.extract_strided_slice %5 {offsets = [6, 0], sizes = [1, 10], strides = [1, 1]} : vector<8x10xf32> to vector<1x10xf32>
    %194 = vector.broadcast %192 : vector<1x1xf32> to vector<1x10xf32>
    %195 = arith.mulf %194, %193 : vector<1x10xf32>
    %196 = arith.addf %191, %195 : vector<1x10xf32>
    %197 = vector.extract_strided_slice %161 {offsets = [0, 7], sizes = [1, 1], strides = [1, 1]} : vector<1x8xf32> to vector<1x1xf32>
    %198 = vector.extract_strided_slice %5 {offsets = [7, 0], sizes = [1, 10], strides = [1, 1]} : vector<8x10xf32> to vector<1x10xf32>
    %199 = vector.broadcast %197 : vector<1x1xf32> to vector<1x10xf32>
    %200 = arith.mulf %199, %198 : vector<1x10xf32>
    %201 = arith.addf %196, %200 : vector<1x10xf32>
    %c0_19 = arith.constant 0 : index
    %c1 = arith.constant 1 : index
    %c0_20 = arith.constant 0 : index
    %202 = vector.load %arg6[%c0_19, %c1, %c0_20] : memref<1x2x10xf32, #tpu.memory_space<vmem>>, vector<1x1x10xf32>
    %203 = vector.shape_cast %202 : vector<1x1x10xf32> to vector<1x10xf32>
    %204 = vector.shape_cast %201 : vector<1x10xf32> to vector<1x1x10xf32>
    tpu.vector_store %arg6[%c0_19, %c1, %c0_20], %204 {strides = array<i32>} : memref<1x2x10xf32, #tpu.memory_space<vmem>>, vector<1x1x10xf32>,
    return
  }
  func.func @transform_0(%arg0: i32) -> (i32, i32, i32) {
    %c0_i32 = arith.constant 0 : i32
    %c0_i32_0 = arith.constant 0 : i32
    %c0_i32_1 = arith.constant 0 : i32
    return %arg0, %c0_i32, %c0_i32_0 : i32, i32, i32
  }
  func.func @transform_1(%arg0: i32) -> (i32, i32) {
    %c0_i32 = arith.constant 0 : i32
    %c0_i32_0 = arith.constant 0 : i32
    %c0_i32_1 = arith.constant 0 : i32
    return %c0_i32, %c0_i32_0 : i32, i32
  }
  func.func @transform_2(%arg0: i32) -> (i32, i32) {
    %c0_i32 = arith.constant 0 : i32
    %c0_i32_0 = arith.constant 0 : i32
    %c0_i32_1 = arith.constant 0 : i32
    return %c0_i32, %c0_i32_0 : i32, i32
  }
  func.func @transform_3(%arg0: i32) -> (i32, i32) {
    %c0_i32 = arith.constant 0 : i32
    %c0_i32_0 = arith.constant 0 : i32
    %c0_i32_1 = arith.constant 0 : i32
    return %c0_i32, %c0_i32_0 : i32, i32
  }
  func.func @transform_4(%arg0: i32) -> (i32, i32) {
    %c0_i32 = arith.constant 0 : i32
    %c0_i32_0 = arith.constant 0 : i32
    %c0_i32_1 = arith.constant 0 : i32
    return %c0_i32, %c0_i32_0 : i32, i32
  }
  func.func @transform_5(%arg0: i32) -> (i32, i32, i32) {
    %c0_i32 = arith.constant 0 : i32
    %c0_i32_0 = arith.constant 0 : i32
    %c0_i32_1 = arith.constant 0 : i32
    return %arg0, %c0_i32, %c0_i32_0 : i32, i32, i32
  }
}

</mosaic_0001>

<bundles_post_ra>
// kernel: classifier_head.1
= control target key start
LH: loop header
LB: loop body
LE: loop exit
PB: predicated region body
PF: predicated region fallthrough
CT: control target
= control target key end

     0   :  { %s3209_s0 = inlined_call_operand.vmem [shape: bf16[1,98,512], index: 0, kind: input, shape index: {}]   ;;  %s3210_s1 = inlined_call_operand.vmem [shape: bf16[512,144], index: 1, kind: input, shape index: {}]   ;;  %s3211_s2 = inlined_call_operand.vmem [shape: f32[16,72], index: 2, kind: input, shape index: {}]   ;;  %s3212_s3 = inlined_call_operand.vmem [shape: f32[8,10], index: 3, kind: input, shape index: {}]   ;;  %s3213_s4 = inlined_call_operand.vmem [shape: f32[1,10], index: 4, kind: input, shape index: {}]   ;;  %s3214_s5 = inlined_call_operand.hbm [shape: f32[1,2,10], index: 5, kind: output, shape index: {}]  }
   0x1   :  { %v2063_v0 = vld [vmem:[%s3210_s1 + $0x4] ss:$8 sps:$4 sm:$0xff]   ;;  %v2065_v1 = vld [vmem:[%s3210_s1] ss:$8 sps:$4 sm:$0xff]   ;;  %v2066_v2 = vld [vmem:[%s3210_s1 + $0x14] ss:$8 sps:$4 sm:$0xff]  }
   0x2   :  { %565 = vmatprep.subr.bf16.mxu0 %v2063_v0  ;;  %v2068_v3 = vld [vmem:[%s3210_s1 + $0x10] ss:$8 sps:$4 sm:$0xff]   ;;  %v2069_v4 = vld [vmem:[%s3210_s1 + $0x24] ss:$8 sps:$4 sm:$0xff]   ;;  %v2299_v6 = vld [vmem:[%s3210_s1 + $0x100] ss:$8 sps:$4 sm:$0xff]  }
   0x3   :  { %566 = vmatpush1.bf16.msra.mxu0 %v2065_v1  ;;  %v2294_v5 = vld [vmem:[%s3210_s1 + $0x104] ss:$8 sps:$4 sm:$0xff]   ;;  %v2071_v7 = vld [vmem:[%s3210_s1 + $0x20] ss:$8 sps:$4 sm:$0xff]   ;;  %v2072_v8 = vld [vmem:[%s3210_s1 + $0x34] ss:$8 sps:$4 sm:$0xff]  }
   0x4   :  { %567 = vmatprep.subr.bf16.mxu0 %v2066_v2  ;;  %1972 = vmatprep.subr.bf16.mxu1 %v2294_v5  ;;  %v2311_v9 = vld [vmem:[%s3210_s1 + $0x114] ss:$8 sps:$4 sm:$0xff]   ;;  %v2317_v10 = vld [vmem:[%s3210_s1 + $0x110] ss:$8 sps:$4 sm:$0xff]   ;;  %v2326_v12 = vld [vmem:[%s3210_s1 + $0x124] ss:$8 sps:$4 sm:$0xff]  }
   0x5   :  { %1988 = vmatpush1.bf16.msra.mxu1 %v2299_v6  ;;  %v2074_v11 = vld [vmem:[%s3210_s1 + $0x30] ss:$8 sps:$4 sm:$0xff]   ;;  %v2078_v13 = vld [vmem:[%s3210_s1 + $0x44] ss:$8 sps:$4 sm:$0xff]   ;;  %v2335_v14 = vld [vmem:[%s3210_s1 + $0x120] ss:$8 sps:$4 sm:$0xff]  }
   0x6   :  { %1973 = vmatprep.subr.bf16.mxu1 %v2311_v9  ;;  %v2341_v15 = vld [vmem:[%s3210_s1 + $0x134] ss:$8 sps:$4 sm:$0xff]   ;;  %v2080_v16 = vld [vmem:[%s3210_s1 + $0x40] ss:$8 sps:$4 sm:$0xff]   ;;  %v2353_v18 = vld [vmem:[%s3210_s1 + $0x130] ss:$8 sps:$4 sm:$0xff]  }
   0x7   :  { %568 = vmatpush1.bf16.msra.mxu0 %v2068_v3  ;;  %v2084_v17 = vld [vmem:[%s3210_s1 + $0x54] ss:$8 sps:$4 sm:$0xff]   ;;  %v2359_v19 = vld [vmem:[%s3210_s1 + $0x144] ss:$8 sps:$4 sm:$0xff]   ;;  %v2086_v20 = vld [vmem:[%s3210_s1 + $0x50] ss:$8 sps:$4 sm:$0xff]  }
   0x8   :  { %569 = vmatprep.subr.bf16.mxu0 %v2069_v4  ;;  %v2090_v21 = vld [vmem:[%s3210_s1 + $0x64] ss:$8 sps:$4 sm:$0xff]   ;;  %v2371_v22 = vld [vmem:[%s3210_s1 + $0x140] ss:$8 sps:$4 sm:$0xff]   ;;  %v2377_v23 = vld [vmem:[%s3210_s1 + $0x154] ss:$8 sps:$4 sm:$0xff]  }
   0x9   :  { %1989 = vmatpush1.bf16.msra.mxu1 %v2317_v10  ;;  %v2092_v24 = vld [vmem:[%s3210_s1 + $0x60] ss:$8 sps:$4 sm:$0xff]   ;;  %v2096_v25 = vld [vmem:[%s3210_s1 + $0x74] ss:$8 sps:$4 sm:$0xff]   ;;  %v2389_v26 = vld [vmem:[%s3210_s1 + $0x150] ss:$8 sps:$4 sm:$0xff]  }
   0xa   :  { %1974 = vmatprep.subr.bf16.mxu1 %v2326_v12  ;;  %v2395_v27 = vld [vmem:[%s3210_s1 + $0x164] ss:$8 sps:$4 sm:$0xff]   ;;  %v2098_v28 = vld [vmem:[%s3210_s1 + $0x70] ss:$8 sps:$4 sm:$0xff]   ;;  %v2407_v30 = vld [vmem:[%s3210_s1 + $0x160] ss:$8 sps:$4 sm:$0xff]  }
   0xb   :  { %570 = vmatpush1.bf16.msra.mxu0 %v2071_v7  ;;  %v2102_v29 = vld [vmem:[%s3210_s1 + $0x84] ss:$8 sps:$4 sm:$0xff]   ;;  %v2413_v31 = vld [vmem:[%s3210_s1 + $0x174] ss:$8 sps:$4 sm:$0xff]   ;;  %v2104_v32 = vld [vmem:[%s3210_s1 + $0x80] ss:$8 sps:$4 sm:$0xff]  }
   0xc   :  { %571 = vmatprep.subr.bf16.mxu0 %v2072_v8  ;;  %v2108_v33 = vld [vmem:[%s3210_s1 + $0x94] ss:$8 sps:$4 sm:$0xff]   ;;  %v2425_v34 = vld [vmem:[%s3210_s1 + $0x170] ss:$8 sps:$4 sm:$0xff]   ;;  %v2431_v35 = vld [vmem:[%s3210_s1 + $0x184] ss:$8 sps:$4 sm:$0xff]  }
   0xd   :  { %1990 = vmatpush1.bf16.msra.mxu1 %v2335_v14  ;;  %v2110_v36 = vld [vmem:[%s3210_s1 + $0x90] ss:$8 sps:$4 sm:$0xff]   ;;  %v2114_v37 = vld [vmem:[%s3210_s1 + $0xa4] ss:$8 sps:$4 sm:$0xff]   ;;  %v2443_v38 = vld [vmem:[%s3210_s1 + $0x180] ss:$8 sps:$4 sm:$0xff]  }
   0xe   :  { %1975 = vmatprep.subr.bf16.mxu1 %v2341_v15  ;;  %v2449_v39 = vld [vmem:[%s3210_s1 + $0x194] ss:$8 sps:$4 sm:$0xff]   ;;  %v2116_v40 = vld [vmem:[%s3210_s1 + $0xa0] ss:$8 sps:$4 sm:$0xff]   ;;  %v2464_v43 = vld [vmem:[%s3210_s1 + $0x190] ss:$8 sps:$4 sm:$0xff]  }
   0xf   :  { %572 = vmatpush1.bf16.msra.mxu0 %v2074_v11  ;;  %v2152_v41 = vld [vmem:[%s3209_s0 + $0x4] ss:$16 sps:$4 sm:$0xff]   ;;  %v2122_v45 = vld [vmem:[%s3210_s1 + $0xb0] ss:$8 sps:$4 sm:$0xff]   ;;  %v2482_v47 = vld [vmem:[%s3210_s1 + $0x1a0] ss:$8 sps:$4 sm:$0xff]  }
  0x10   :  { %573 = vmatprep.subr.bf16.mxu0 %v2078_v13  ;;  %v2120_v42 = vld [vmem:[%s3210_s1 + $0xb4] ss:$8 sps:$4 sm:$0xff]   ;;  %597 = vmatprep.mubr.bf16.mxu0 %v2152_v41  ;;  %v2470_v44 = vld [vmem:[%s3210_s1 + $0x1a4] ss:$8 sps:$4 sm:$0xff]   ;;  %v2128_v50 = vld [vmem:[%s3210_s1 + $0xc0] ss:$8 sps:$4 sm:$0xff]  }
  0x11   :  { %1991 = vmatpush1.bf16.msra.mxu1 %v2353_v18  ;;  %v2126_v46 = vld [vmem:[%s3210_s1 + $0xc4] ss:$8 sps:$4 sm:$0xff]   ;;  %v2488_v48 = vld [vmem:[%s3210_s1 + $0x1b4] ss:$8 sps:$4 sm:$0xff]   ;;  %v2503_v52 = vld [vmem:[%s3210_s1 + $0x1b0] ss:$8 sps:$4 sm:$0xff]  }
  0x12   :  { %1976 = vmatprep.subr.bf16.mxu1 %v2359_v19  ;;  %v2167_v49 = vld [vmem:[%s3209_s0 + $0x4c] ss:$16 sps:$4 sm:$0xff]   ;;  %v2134_v54 = vld [vmem:[%s3210_s1 + $0xd0] ss:$8 sps:$4 sm:$0xff]   ;;  %v2521_v56 = vld [vmem:[%s3210_s1 + $0x1c0] ss:$8 sps:$4 sm:$0xff]  }
  0x13   :  { %574 = vmatpush1.bf16.msra.mxu0 %v2080_v16  ;;  %v2132_v51 = vld [vmem:[%s3210_s1 + $0xd4] ss:$8 sps:$4 sm:$0xff]   ;;  %713 = vmatprep.mubr.bf16.mxu1 %v2167_v49  ;;  %v2509_v53 = vld [vmem:[%s3210_s1 + $0x1c4] ss:$8 sps:$4 sm:$0xff]   ;;  %v2140_v58 = vld [vmem:[%s3210_s1 + $0xe0] ss:$8 sps:$4 sm:$0xff]  }
  0x14   :  { %575 = vmatprep.subr.bf16.mxu0 %v2084_v17  ;;  %v2138_v55 = vld [vmem:[%s3210_s1 + $0xe4] ss:$8 sps:$4 sm:$0xff]   ;;  %v2527_v57 = vld [vmem:[%s3210_s1 + $0x1d4] ss:$8 sps:$4 sm:$0xff]   ;;  %v2539_v60 = vld [vmem:[%s3210_s1 + $0x1d0] ss:$8 sps:$4 sm:$0xff]  }
  0x15   :  { %1992 = vmatpush1.bf16.msra.mxu1 %v2371_v22  ;;  %v2144_v59 = vld [vmem:[%s3210_s1 + $0xf4] ss:$8 sps:$4 sm:$0xff]   ;;  %v2545_v61 = vld [vmem:[%s3210_s1 + $0x1e4] ss:$8 sps:$4 sm:$0xff]   ;;  %v2146_v62 = vld [vmem:[%s3210_s1 + $0xf0] ss:$8 sps:$4 sm:$0xff]  }
  0x16   :  { %1977 = vmatprep.subr.bf16.mxu1 %v2377_v23 }
  0x17   :  { %576 = vmatpush1.bf16.msra.mxu0 %v2086_v20 }
  0x18   :  { %577 = vmatprep.subr.bf16.mxu0 %v2090_v21 }
  0x19   :  { %1993 = vmatpush1.bf16.msra.mxu1 %v2389_v26 }
  0x1a   :  { %1978 = vmatprep.subr.bf16.mxu1 %v2395_v27 }
  0x1b   :  { %578 = vmatpush1.bf16.msra.mxu0 %v2092_v24 }
  0x1c   :  { %579 = vmatprep.subr.bf16.mxu0 %v2096_v25 }
  0x1d   :  { %1994 = vmatpush1.bf16.msra.mxu1 %v2407_v30 }
  0x1e   :  { %1979 = vmatprep.subr.bf16.mxu1 %v2413_v31 }
  0x1f   :  { %580 = vmatpush1.bf16.msra.mxu0 %v2098_v28 }
  0x20   :  { %581 = vmatprep.subr.bf16.mxu0 %v2102_v29 }
  0x21   :  { %1995 = vmatpush1.bf16.msra.mxu1 %v2425_v34 }
  0x22   :  { %1980 = vmatprep.subr.bf16.mxu1 %v2431_v35 }
  0x23   :  { %582 = vmatpush1.bf16.msra.mxu0 %v2104_v32 }
  0x24   :  { %583 = vmatprep.subr.bf16.mxu0 %v2108_v33 }
  0x25   :  { %1996 = vmatpush1.bf16.msra.mxu1 %v2443_v38 }
  0x26   :  { %1981 = vmatprep.subr.bf16.mxu1 %v2449_v39 }
  0x27   :  { %584 = vmatpush1.bf16.msra.mxu0 %v2110_v36 }
  0x28   :  { %585 = vmatprep.subr.bf16.mxu0 %v2114_v37 }
  0x29   :  { %1997 = vmatpush1.bf16.msra.mxu1 %v2464_v43 }
  0x2a   :  { %1982 = vmatprep.subr.bf16.mxu1 %v2470_v44 }
  0x2b   :  { %586 = vmatpush1.bf16.msra.mxu0 %v2116_v40 }
  0x2c   :  { %587 = vmatprep.subr.bf16.mxu0 %v2120_v42 }
  0x2d   :  { %1998 = vmatpush1.bf16.msra.mxu1 %v2482_v47 }
  0x2e   :  { %1983 = vmatprep.subr.bf16.mxu1 %v2488_v48 }
  0x2f   :  { %588 = vmatpush1.bf16.msra.mxu0 %v2122_v45 }
  0x30   :  { %589 = vmatprep.subr.bf16.mxu0 %v2126_v46 }
  0x31   :  { %1999 = vmatpush1.bf16.msra.mxu1 %v2503_v52 }
  0x32   :  { %1984 = vmatprep.subr.bf16.mxu1 %v2509_v53 }
  0x33   :  { %590 = vmatpush1.bf16.msra.mxu0 %v2128_v50 }
  0x34   :  { %591 = vmatprep.subr.bf16.mxu0 %v2132_v51 }
  0x35   :  { %2000 = vmatpush1.bf16.msra.mxu1 %v2521_v56 }
  0x36   :  { %1985 = vmatprep.subr.bf16.mxu1 %v2527_v57 }
  0x37   :  { %592 = vmatpush1.bf16.msra.mxu0 %v2134_v54 }
  0x38   :  { %593 = vmatprep.subr.bf16.mxu0 %v2138_v55 }
  0x3b   :  { %594 = vmatpush1.bf16.msra.mxu0 %v2140_v58 }
  0x3c   :  { %10 = vsyncpa [#allocation3], 0  ;;  %595 = vmatprep.subr.bf16.mxu0 %v2144_v59  ;;  %2001 = vmatpush1.bf16.msra.mxu1 %v2539_v60  ;;  %v2554_v63 = vld [vmem:[%s3210_s1 + $0x1e0] ss:$8 sps:$4 sm:$0xff]   ;;  %v2563_v1 = vld [vmem:[%s3210_s1 + $0x1f4] ss:$8 sps:$4 sm:$0xff]  }
  0x3d   :  { %v2150_v0 = vld [vmem:[%s3209_s0] ss:$16 sps:$4 sm:$0xff]   ;;  %1986 = vmatprep.subr.bf16.mxu1 %v2545_v61  ;;  %v2159_v2 = vld [vmem:[%s3209_s0 + $0x24] ss:$16 sps:$4 sm:$0xff]   ;;  %v2165_v4 = vld [vmem:[%s3209_s0 + $0x48] ss:$16 sps:$4 sm:$0xff]  }
  0x3e   :  { %v2573_v3 = vld [vmem:[%s3210_s1 + $0x1f0] ss:$8 sps:$4 sm:$0xff]   ;;  %v2171_v11 = vld [vmem:[%s3209_s0 + $0x64] ss:$16 sps:$4 sm:$0xff]   ;;  %v2185_v13 = vld [vmem:[%s3209_s0 + $0xac] ss:$16 sps:$4 sm:$0xff]  }
  0x3f   :  { %596 = vmatpush1.bf16.msra.mxu0 %v2146_v62  ;;  %v2161_v7 = vld [vmem:[%s3209_s0 + $0x20] ss:$16 sps:$4 sm:$0xff]   ;;  %v2176_v8 = vld [vmem:[%s3209_s0 + $0x68] ss:$16 sps:$4 sm:$0xff]   ;;  %v2183_v20 = vld [vmem:[%s3209_s0 + $0xa4] ss:$16 sps:$4 sm:$0xff]  }
  0x40   :  { %663 = vmatprep.subr.bf16.mxu0 %v2294_v5  ;;  %2002 = vmatpush1.bf16.msra.mxu1 %v2554_v63  ;;  %v2173_v5 = vld [vmem:[%s3209_s0 + $0x6c] ss:$16 sps:$4 sm:$0xff]   ;;  %v2188_v17 = vld [vmem:[%s3209_s0 + $0xa8] ss:$16 sps:$4 sm:$0xff]   ;;  %v45_v21 = vld [vmem:[%s3209_s0 + $0xc0] sm:$0x11] }
  0x41   :  { %1987 = vmatprep.subr.bf16.mxu1 %v2563_v1  ;;  %v46_v16 = vld [vmem:[%s3209_s0 + $0xc8] sm:$0x11]  ;;  %v1837_v24 = vcombine.high %v45_v21, %v45_v21  ;;  %v1836_v25 = vcombine.low %v45_v21, %v45_v21  ;;  %s2223_s21 = smov 64   ;;  %s2225_s22 = smov 80   ;;  %vm770_vm0 = vcmask 1046528   ;;  %vm903_vm1 = vcmask 1041408  }
  0x42   :  { %598 = vmatmul.mubr.bf16.vlgmr.msra.gmra.mrb[0].mxu0 %v2150_v0  ;;  %v2196_v28 = vld [vmem:[%s3209_s0 + $0x2c] ss:$16 sps:$4 sm:$0xff]   ;;  %v2198_v29 = vld [vmem:[%s3209_s0 + $0x28] ss:$16 sps:$4 sm:$0xff]   ;;  %s2226_s23 = smov 96   ;;  %s2227_s24 = smov 48  }
  0x43   :  { %664 = vmatpush1.bf16.msra.mxu0 %v2299_v6  ;;  %605 = vmatprep.mubr.bf16.mxu0 %v2159_v2  ;;  %v2168_v6 = vld [vmem:[%s3209_s0 + $0x44] ss:$16 sps:$4 sm:$0xff]   ;;  %s2228_s25 = smov 32   ;;  %s2229_s26 = smov 16   ;;  %vm830_vm2 = vcmask 1040384   ;;  %vm800_vm3 = vcmask 1045504  }
  0x44   :  { %665 = vmatprep.subr.bf16.mxu0 %v2311_v9  ;;  %2003 = vmatpush1.bf16.msra.mxu1 %v2573_v3  ;;  %v2179_v9 = vld [vmem:[%s3209_s0 + $0x8c] ss:$16 sps:$4 sm:$0xff]   ;;  %vm2231_vm4 = vmmov 0   ;;  %vm965_vm5 = vcmask 130048   ;;  %s2234_s6 = smov 88   ;;  %s2235_s7 = smov 104  }
  0x45   :  { %s2236_s1 = smov 72   ;;  %vm1285_vm6 = vcmask 73728  }
  0x47   :  { %666 = vmatpush1.bf16.msra.mxu0 %v2317_v10  ;;  %714 = vmatmul.mubr.bf16.vlgmr.msra.gmra.mrb[0].mxu1 %v2165_v4  ;;  %v2170_v10 = vld [vmem:[%s3209_s0 + $0x40] ss:$16 sps:$4 sm:$0xff]  }
  0x48   :  { %667 = vmatprep.subr.bf16.mxu0 %v2326_v12  ;;  %723 = vmatprep.mubr.bf16.mxu1 %v2173_v5  ;;  %v2182_v12 = vld [vmem:[%s3209_s0 + $0x88] ss:$16 sps:$4 sm:$0xff]  }
  0x4a   :  { %606 = vmatmul.mubr.bf16.gmra.mrb[4].mxu0 %v2161_v7 }
  0x4b   :  { %668 = vmatpush1.bf16.msra.mxu0 %v2335_v14  ;;  %615 = vmatprep.mubr.bf16.mxu0 %v2168_v6  ;;  %v2175_v14 = vld [vmem:[%s3209_s0 + $0x60] ss:$16 sps:$4 sm:$0xff]  }
  0x4c   :  { %669 = vmatprep.subr.bf16.mxu0 %v2341_v15  ;;  %v2177_v15 = vld [vmem:[%s3209_s0 + $0x84] ss:$16 sps:$4 sm:$0xff]  }
  0x4f   :  { %670 = vmatpush1.bf16.msra.mxu0 %v2353_v18  ;;  %724 = vmatmul.mubr.bf16.gmra.mrb[4].mxu1 %v2176_v8  ;;  %v1839_v18 = vcombine.high %v46_v16, %v46_v16 }
  0x50   :  { %671 = vmatprep.subr.bf16.mxu0 %v2359_v19  ;;  %732 = vmatprep.mubr.bf16.mxu1 %v2179_v9  ;;  %v2181_v19 = vld [vmem:[%s3209_s0 + $0x80] ss:$16 sps:$4 sm:$0xff]  }
  0x52   :  { %616 = vmatmul.mubr.bf16.gmra.mrb[8].mxu0 %v2170_v10 }
  0x53   :  { %672 = vmatpush1.bf16.msra.mxu0 %v2371_v22  ;;  %625 = vmatprep.mubr.bf16.mxu0 %v2171_v11  ;;  %v1838_v22 = vcombine.low %v46_v16, %v46_v16 }
  0x54   :  { %673 = vmatprep.subr.bf16.mxu0 %v2377_v23  ;;  %v2187_v23 = vld [vmem:[%s3209_s0 + $0xa0] ss:$16 sps:$4 sm:$0xff]  }
  0x57   :  { %674 = vmatpush1.bf16.msra.mxu0 %v2389_v26  ;;  %733 = vmatmul.mubr.bf16.gmra.mrb[8].mxu1 %v2182_v12  ;;  %v2195_v26 = vld [vmem:[%s3209_s0 + $0xc] ss:$16 sps:$4 sm:$0xff]  }
  0x58   :  { %675 = vmatprep.subr.bf16.mxu0 %v2395_v27  ;;  %742 = vmatprep.mubr.bf16.mxu1 %v2185_v13  ;;  %v2193_v27 = vld [vmem:[%s3209_s0 + $0x8] ss:$16 sps:$4 sm:$0xff]   ;;  %s2224_s0 = smov 112  }
  0x5a   :  { %626 = vmatmul.mubr.bf16.gmra.mrb[12].mxu0 %v2175_v14 }
  0x5b   :  { %676 = vmatpush1.bf16.msra.mxu0 %v2407_v30  ;;  %634 = vmatprep.mubr.bf16.mxu0 %v2177_v15 }
  0x5c   :  { %677 = vmatprep.subr.bf16.mxu0 %v2413_v31 }
  0x5f   :  { %678 = vmatpush1.bf16.msra.mxu0 %v2425_v34  ;;  %743 = vmatmul.mubr.bf16.gmra.mrb[12].mxu1 %v2188_v17 }
  0x60   :  { %679 = vmatprep.subr.bf16.mxu0 %v2431_v35  ;;  %752 = vmatprep.mubr.bf16.mxu1 %v1839_v18 }
  0x62   :  { %635 = vmatmul.mubr.bf16.gmra.mrb[16].mxu0 %v2181_v19 }
  0x63   :  { %680 = vmatpush1.bf16.msra.mxu0 %v2443_v38  ;;  %644 = vmatprep.mubr.bf16.mxu0 %v2183_v20 }
  0x64   :  { %681 = vmatprep.subr.bf16.mxu0 %v2449_v39 }
  0x67   :  { %682 = vmatpush1.bf16.msra.mxu0 %v2464_v43  ;;  %753 = vmatmul.mubr.bf16.gmra.mrb[16].mxu1 %v1838_v22 }
  0x68   :  { %683 = vmatprep.subr.bf16.mxu0 %v2470_v44 }
  0x6a   :  { %645 = vmatmul.mubr.bf16.gmra.mrb[20].mxu0 %v2187_v23 }
  0x6b   :  { %684 = vmatpush1.bf16.msra.mxu0 %v2482_v47  ;;  %654 = vmatprep.mubr.bf16.mxu0 %v1837_v24 }
  0x6c   :  { %685 = vmatprep.subr.bf16.mxu0 %v2488_v48 }
  0x6f   :  { %686 = vmatpush1.bf16.msra.mxu0 %v2503_v52 }
  0x70   :  { %687 = vmatprep.subr.bf16.mxu0 %v2509_v53 }
  0x72   :  { %655 = vmatmul.mubr.bf16.gmra.mrb[24].mxu0 %v1836_v25 }
  0x73   :  { %688 = vmatpush1.bf16.msra.mxu0 %v2521_v56  ;;  %695 = vmatprep.mubr.bf16.mxu0 %v2195_v26 }
  0x74   :  { %689 = vmatprep.subr.bf16.mxu0 %v2527_v57 }
  0x77   :  { %690 = vmatpush1.bf16.msra.mxu0 %v2539_v60 }
  0x78   :  { %691 = vmatprep.subr.bf16.mxu0 %v2545_v61 }
  0x7b   :  { %692 = vmatpush1.bf16.msra.mxu0 %v2554_v63 }
  0x7c   :  { %693 = vmatprep.subr.bf16.mxu0 %v2563_v1 }
  0x7f   :  { %694 = vmatpush1.bf16.msra.mxu0 %v2573_v3 }
  0x82   :  { %696 = vmatmul.mubr.bf16.vlgmr.msra.gmra.mrb[0].mxu0 %v2193_v27 }
  0x83   :  { %703 = vmatprep.mubr.bf16.mxu0 %v2196_v28 }
  0x8a   :  { %704 = vmatmul.mubr.bf16.gmra.mrb[4].mxu0 %v2198_v29 }
 0x11a   :  { %v715_v30 = vpop.f32.mrb[0].mxu1 }
 0x11b   :  { %v717_v31 = vpop.f32.mrb[1].mxu1 }
 0x11c   :  { %v719_v32 = vpop.f32.mrb[2].mxu1 }
 0x11d   :  { %v721_v33 = vpop.f32.mrb[3].mxu1 }
 0x122   :  { %v725_v34 = vpop.f32.mrb[4].mxu1 }
 0x123   :  { %v727_v35 = vpop.f32.mrb[5].mxu1 }
 0x124   :  { %v729_v37 = vpop.f32.mrb[6].mxu1 }
 0x125   :  { %v617_v36 = vpop.f32.mrb[8].mxu0  ;;  %v731_v40 = vpop.f32.mrb[7].mxu1 }
 0x126   :  { %v2674_v38 = vadd.f32 %v715_v30, %v617_v36  ;;  %v619_v39 = vpop.f32.mrb[9].mxu0 }
 0x127   :  { %v2676_v41 = vadd.f32 %v717_v31, %v619_v39  ;;  %v621_v42 = vpop.f32.mrb[10].mxu0 }
 0x128   :  { %v720_v43 = vadd.f32 %v719_v32, %v621_v42  ;;  %867 = vrot.lane.b32.xlu0 %v2674_v38, %s2223_s21  ;;  %v623_v44 = vpop.f32.mrb[11].mxu0  ;;  %v2681_v45 = vrot.slane %v2674_v38, 1  ;;  %v2688_v47 = vrot.slane %v2674_v38, 7  ;;  %v808_v49 = vrot.slane %v2674_v38, 2 }
 0x129   :  { %v2683_v46 = vadd.f32 %v721_v33, %v623_v44  ;;  %v909_v6 = vrot.slane %v2674_v38, 6 }
 0x12a   :  { %788 = vrot.lane.b32.xlu1 %v2681_v45, %s2224_s0  ;;  %v734_v48 = vpop.f32.mrb[8].mxu1  ;;  %v881_v58 = vrot.slane %v720_v43, 1  ;;  %v911_v61 = vrot.slane %v720_v43, 6  ;;  %v933_v3 = vrot.slane %v720_v43, 7 }
 0x12b   :  { %v736_v50 = vpop.f32.mrb[9].mxu1 }
 0x12c   :  { %848 = vrot.lane.b32.xlu0 %v2688_v47, %s2225_s22  ;;  %v738_v52 = vpop.f32.mrb[10].mxu1  ;;  %v882_v0 = vsel %vm770_vm0, %v2681_v45, %v881_v58  ;;  %v912_v12 = vsel %vm903_vm1, %v909_v6, %v911_v61  ;;  %v934_v14 = vsel %vm830_vm2, %v2688_v47, %v933_v3 }
 0x12d   :  { %v627_v51 = vpop.f32.mrb[12].mxu0  ;;  %v740_v55 = vpop.f32.mrb[11].mxu1 }
 0x12e   :  { %818 = vrot.lane.b32.xlu1 %v808_v49, %s2226_s23  ;;  %v2696_v53 = vadd.f32 %v725_v34, %v627_v51  ;;  %v629_v54 = vpop.f32.mrb[13].mxu0 }
 0x12f   :  { %v2698_v56 = vadd.f32 %v727_v35, %v629_v54  ;;  %v631_v57 = vpop.f32.mrb[14].mxu0 }
 0x130   :  { %869 = vrot.lane.b32.xlu0 %v720_v43, %s2223_s21  ;;  %v2701_v59 = vadd.f32 %v729_v37, %v631_v57  ;;  %v633_v60 = vpop.f32.mrb[15].mxu0  ;;  %v1292_v17 = vrot.slane %v2696_v53, 1  ;;  %v1321_v25 = vrot.slane %v2696_v53, 2 }
 0x132   :  { %891 = vrot.lane.b32.xlu1 %v881_v58, %s2227_s24  ;;  %v744_v62 = vpop.f32.mrb[12].mxu1  ;;  %v1293_v18 = vrot.slane %v2701_v59, 1  ;;  %v1351_v21 = vrot.slane %v2701_v59, 7  ;;  %v1322_v26 = vrot.slane %v2701_v59, 2 }
 0x133   :  { %v746_v63 = vpop.f32.mrb[13].mxu1 }
 0x134   :  { %921 = vrot.lane.b32.xlu0 %v911_v61, %s2228_s25  ;;  %v748_v2 = vpop.f32.mrb[14].mxu1  ;;  %v1294_v31 = vsel %vm770_vm0, %v1292_v17, %v1293_v18  ;;  %v1323_v33 = vsel %vm800_vm3, %v1321_v25, %v1322_v26  ;;  %v761_v25 = vld [vmem:[%s3211_s2] sm:$0xff] }
 0x135   :  { %v636_v1 = vpop.f32.mrb[16].mxu0  ;;  %v750_v7 = vpop.f32.mrb[15].mxu1 }
 0x136   :  { %889 = vrot.lane.b32.xlu1 %v882_v0, %s2227_s24  ;;  %v2708_v4 = vadd.f32 %v734_v48, %v636_v1  ;;  %v638_v5 = vpop.f32.mrb[17].mxu0 }
 0x137   :  { %v2711_v8 = vadd.f32 %v736_v50, %v638_v5  ;;  %v640_v9 = vpop.f32.mrb[18].mxu0 }
 0x138   :  { %943 = vrot.lane.b32.xlu0 %v933_v3, %s2229_s26  ;;  %v2714_v10 = vadd.f32 %v738_v52, %v640_v9  ;;  %v642_v11 = vpop.f32.mrb[19].mxu0  ;;  %v1295_v39 = vrot.slane %v2708_v4, 1  ;;  %v1352_v43 = vrot.slane %v2708_v4, 7  ;;  %v1324_v50 = vrot.slane %v2708_v4, 2 }
 0x139   :  { %v2719_v13 = vadd.f32 %v740_v55, %v642_v11  ;;  %v1422_v55 = vrot.slane %v2701_v59, 6  ;;  %v1423_v57 = vrot.slane %v2708_v4, 6 }
 0x13a   :  { %919 = vrot.lane.b32.xlu1 %v912_v12, %s2228_s25  ;;  %v754_v15 = vpop.f32.mrb[16].mxu1  ;;  %v1296_v52 = vsel %vm770_vm0, %v1293_v18, %v1295_v39  ;;  %v1325_v54 = vsel %vm800_vm3, %v1322_v26, %v1324_v50  ;;  %v1353_v58 = vsel %vm830_vm2, %v1351_v21, %v1352_v43  ;;  %v1297_v60 = vrot.slane %v2714_v10, 1  ;;  %v762_v26 = vld [vmem:[%s3211_s2 + $0x8] sm:$0xff]  ;;  %s2233_s2 = smov 120  }
 0x13b   :  { %v756_v16 = vpop.f32.mrb[17].mxu1  ;;  %v1424_v61 = vsel %vm903_vm1, %v1422_v55, %v1423_v57  ;;  %v1354_v1 = vrot.slane %v2714_v10, 7 }
 0x13c   :  { %941 = vrot.lane.b32.xlu0 %v934_v14, %s2229_s26  ;;  %v758_v20 = vpop.f32.mrb[18].mxu1  ;;  %v1298_v0 = vsel %vm770_vm0, %v1295_v39, %v1297_v60 }
 0x13d   :  { %v646_v19 = vpop.f32.mrb[20].mxu0  ;;  %v759_v24 = vpop.f32.mrb[19].mxu1  ;;  %v1355_v17 = vsel %vm830_vm2, %v1352_v43, %v1354_v1 }
 0x13e   :  { %1380 = vrot.lane.b32.xlu1 %v2701_v59, %s2223_s21  ;;  %v2730_v22 = vadd.f32 %v744_v62, %v646_v19  ;;  %v648_v23 = vpop.f32.mrb[21].mxu0  ;;  %v1326_v62 = vrot.slane %v2714_v10, 2 }
 0x13f   :  { %v2734_v27 = vadd.f32 %v746_v63, %v648_v23  ;;  %v650_v28 = vpop.f32.mrb[22].mxu0  ;;  %v1425_v23 = vrot.slane %v2714_v10, 6 }
 0x140   :  { %1360 = vrot.lane.b32.xlu0 %v1351_v21, %s2225_s22  ;;  %v2737_v29 = vadd.f32 %v748_v2, %v650_v28  ;;  %v652_v30 = vpop.f32.mrb[23].mxu0  ;;  %v1327_v9 = vsel %vm800_vm3, %v1324_v50, %v1326_v62  ;;  %v2799_v21 = vrot.slane %v2730_v22, 1 }
 0x141   :  { %v2740_v32 = vadd.f32 %v750_v7, %v652_v30 }
 0x142   :  { %1301 = vrot.lane.b32.xlu1 %v1294_v31, %s2224_s0  ;;  %v1358_v37 = vrot.slane %v2737_v29, 7  ;;  %v1300_v39 = vsel %vm770_vm0, %v1297_v60, %v2799_v21 }
 0x144   :  { %1330 = vrot.lane.b32.xlu0 %v1323_v33, %s2226_s23 }
 0x145   :  { %v656_v34 = vpop.f32.mrb[24].mxu0 }
 0x146   :  { %1384 = vrot.lane.b32.xlu1 %v2714_v10, %s2223_s21  ;;  %v755_v35 = vadd.f32 %v754_v15, %v656_v34  ;;  %v658_v36 = vpop.f32.mrb[25].mxu0 }
 0x147   :  { %v660_v40 = vpop.f32.mrb[26].mxu0  ;;  %v2749_v42 = vadd.f32 %v756_v16, %v658_v36 }
 0x148   :  { %1382 = vrot.lane.b32.xlu0 %v2708_v4, %s2223_s21  ;;  %v1452_v44 = vrot.slane %v755_v35, 7  ;;  %v661_v48 = vpop.f32.mrb[27].mxu0  ;;  %v2230_v35 = vmov 0.0|0.0   ;;  %v1426_v40 = vsel %vm903_vm1, %v1423_v57, %v1425_v23 }
 0x149   :  { %1966 = vmatprep.subr.bf16.mxu1 %v2230_v35 }
 0x14a   :  { %1454 = vrot.lane.b32.xlu1 %v1352_v43, %s2229_s26  ;;  %v2759_v51 = vsel %vm830_vm2, %v1358_v37, %v1452_v44  ;;  %v2826_v44 = vpack.c.bf16 %v762_v26, %v761_v25  ;;  %v1429_v25 = vrot.slane %v2737_v29, 6 }
 0x14c   :  { %1303 = vrot.lane.b32.xlu0 %v1296_v52, %s2224_s0  ;;  %1968 = vmatpush3.bf16.msra.mxu1 %v2826_v44 }
 0x14d   :  { %1969 = vmatprep.subr.bf16.mxu1 %v2230_v35 }
 0x14e   :  { %1332 = vrot.lane.b32.xlu1 %v1325_v54, %s2226_s23 }
 0x150   :  { %1402 = vrot.lane.b32.xlu0 %v1296_v52, %s2227_s24 }
 0x152   :  { %1362 = vrot.lane.b32.xlu1 %v1353_v58, %s2225_s22 }
 0x154   :  { %1431 = vrot.lane.b32.xlu0 %v1424_v61, %s2228_s25 }
 0x155   :  { %v2774_v63 = vpop.f32.mrb[0].mxu0 }
 0x156   :  { %1305 = vrot.lane.b32.xlu1 %v1298_v0, %s2224_s0  ;;  %v699_v2 = vpop.f32.mrb[1].mxu0  ;;  %v771_v3 = vrot.slane %v2774_v63, 1  ;;  %v801_v5 = vrot.slane %v2774_v63, 2  ;;  %v831_v11 = vrot.slane %v2774_v63, 7 }
 0x157   :  { %v2781_v7 = vpop.f32.mrb[2].mxu0 }
 0x158   :  { %1334 = vrot.lane.b32.xlu0 %v1327_v9, %s2226_s23  ;;  %v702_v12 = vpop.f32.mrb[3].mxu0  ;;  %v772_v14 = vrot.slane %v2781_v7, 1  ;;  %v802_v15 = vrot.slane %v2781_v7, 2  ;;  %v832_v16 = vrot.slane %v2781_v7, 7  ;;  %v904_v43 = vrot.slane %v2781_v7, 6 }
 0x15a   :  { %1364 = vrot.lane.b32.xlu1 %v1355_v17, %s2225_s22  ;;  %v773_v18 = vsel %vm770_vm0, %v771_v3, %v772_v14  ;;  %v803_v19 = vsel %vm800_vm3, %v801_v5, %v802_v15  ;;  %v833_v20 = vsel %vm830_vm2, %v831_v11, %v832_v16 }
 0x15c   :  { %1456 = vrot.lane.b32.xlu0 %v1355_v17, %s2229_s26 }
 0x15d   :  { %v2803_v24 = vpop.f32.mrb[4].mxu0 }
 0x15e   :  { %1404 = vrot.lane.b32.xlu1 %v1298_v0, %s2227_s24  ;;  %v2812_v28 = vpop.f32.mrb[5].mxu0  ;;  %v804_v30 = vrot.slane %v2803_v24, 2  ;;  %v774_v31 = vrot.slane %v2803_v24, 1  ;;  %v834_v33 = vrot.slane %v2803_v24, 7  ;;  %v905_v34 = vrot.slane %v2803_v24, 6 }
 0x15f   :  { %v2818_v36 = vpop.f32.mrb[6].mxu0 }
 0x160   :  { %1406 = vrot.lane.b32.xlu0 %v1300_v39, %s2227_s24  ;;  %v2829_v48 = vpop.f32.mrb[7].mxu0  ;;  %v805_v50 = vsel %vm800_vm3, %v802_v15, %v804_v30  ;;  %v775_v52 = vsel %vm770_vm0, %v772_v14, %v774_v31  ;;  %v776_v54 = vrot.slane %v2818_v36, 1  ;;  %v835_v55 = vsel %vm830_vm2, %v832_v16, %v834_v33 }
 0x161   :  { %v906_v58 = vsel %vm903_vm1, %v904_v43, %v905_v34  ;;  %v806_v57 = vrot.slane %v2818_v36, 2  ;;  %v907_v60 = vrot.slane %v2818_v36, 6  ;;  %v836_v61 = vrot.slane %v2818_v36, 7 }
 0x162   :  { %1433 = vrot.lane.b32.xlu1 %v1426_v40, %s2228_s25  ;;  %v777_v0 = vsel %vm770_vm0, %v774_v31, %v776_v54  ;;  %v779_v2 = vsel %vm770_vm0, %v776_v54, %v2681_v45  ;;  %v1356_v15 = vrot.slane %v2730_v22, 7 }
 0x163   :  { %v809_v3 = vsel %vm800_vm3, %v806_v57, %v808_v49  ;;  %v807_v5 = vsel %vm800_vm3, %v804_v30, %v806_v57  ;;  %v908_v9 = vsel %vm903_vm1, %v905_v34, %v907_v60  ;;  %v837_v11 = vsel %vm830_vm2, %v834_v33, %v836_v61 }
 0x164   :  { %780 = vrot.lane.b32.xlu0 %v773_v18, %s2224_s0  ;;  %v839_v12 = vsel %vm830_vm2, %v836_v61, %v2688_v47  ;;  %v910_v45 = vsel %vm903_vm1, %v907_v60, %v909_v6  ;;  %v2232_v47 = vmov 0.0   ;;  %v1328_v49 = vrot.slane %v2730_v22, 2 }
 0x165   :  { %1932 = vmatprep.mubr.msk.f32.mxu1 %vm2231_vm4, %v2232_v47  ;;  %v1427_v6 = vrot.slane %v2730_v22, 6  ;;  %v1357_v17 = vsel %vm830_vm2, %v1354_v1, %v1356_v15 }
 0x166   :  { %1307 = vrot.lane.b32.xlu1 %v1300_v39, %s2224_s0  ;;  %v1329_v14 = vsel %vm800_vm3, %v1326_v62, %v1328_v49  ;;  %v1400_v62 = vrot.slane %v2737_v29, 1 }
 0x167   :  { %v1428_v16 = vsel %vm903_vm1, %v1425_v23, %v1427_v6  ;;  %v1430_v31 = vsel %vm903_vm1, %v1427_v6, %v1429_v25 }
 0x168   :  { %810 = vrot.lane.b32.xlu0 %v803_v19, %s2226_s23  ;;  %v1401_v1 = vsel %vm770_vm0, %v2799_v21, %v1400_v62 }
 0x16a   :  { %861 = vrot.lane.b32.xlu1 %v2781_v7, %s2223_s21 }
 0x16c   :  { %863 = vrot.lane.b32.xlu0 %v2803_v24, %s2223_s21 }
 0x16e   :  { %840 = vrot.lane.b32.xlu1 %v833_v20, %s2225_s22 }
 0x170   :  { %812 = vrot.lane.b32.xlu0 %v805_v50, %s2226_s23 }
 0x172   :  { %865 = vrot.lane.b32.xlu1 %v2818_v36, %s2223_s21 }
 0x174   :  { %883 = vrot.lane.b32.xlu0 %v775_v52, %s2227_s24 }
 0x176   :  { %782 = vrot.lane.b32.xlu1 %v775_v52, %s2224_s0 }
 0x178   :  { %784 = vrot.lane.b32.xlu0 %v777_v0, %s2224_s0 }
 0x17a   :  { %842 = vrot.lane.b32.xlu1 %v835_v55, %s2225_s22 }
 0x17c   :  { %786 = vrot.lane.b32.xlu0 %v779_v2, %s2224_s0 }
 0x17e   :  { %913 = vrot.lane.b32.xlu1 %v906_v58, %s2228_s25 }
 0x180   :  { %885 = vrot.lane.b32.xlu0 %v777_v0, %s2227_s24 }
 0x182   :  { %935 = vrot.lane.b32.xlu1 %v835_v55, %s2229_s26 }
 0x184   :  { %816 = vrot.lane.b32.xlu0 %v809_v3, %s2226_s23 }
 0x186   :  { %814 = vrot.lane.b32.xlu1 %v807_v5, %s2226_s23 }
 0x188   :  { %915 = vrot.lane.b32.xlu0 %v908_v9, %s2228_s25 }
 0x18a   :  { %844 = vrot.lane.b32.xlu1 %v837_v11, %s2225_s22 }
 0x18c   :  { %846 = vrot.lane.b32.xlu0 %v839_v12, %s2225_s22 }
 0x18e   :  { %887 = vrot.lane.b32.xlu1 %v779_v2, %s2227_s24 }
 0x190   :  { %937 = vrot.lane.b32.xlu0 %v837_v11, %s2229_s26 }
 0x192   :  { %917 = vrot.lane.b32.xlu1 %v910_v45, %s2228_s25 }
 0x194   :  { %939 = vrot.lane.b32.xlu0 %v839_v12, %s2229_s26 }
 0x196   :  { %1336 = vrot.lane.b32.xlu1 %v1329_v14, %s2226_s23 }
 0x198   :  { %1435 = vrot.lane.b32.xlu0 %v1428_v16, %s2228_s25 }
 0x19a   :  { %v2899_v18 = vpop.permute.xlu0 %867  ;;  %1366 = vrot.lane.b32.xlu1 %v1357_v17, %s2225_s22 }
 0x19c   :  { %v2902_v19 = vpop.permute.xlu1 %788  ;;  %1458 = vrot.lane.b32.xlu0 %v1357_v17, %s2229_s26 }
 0x19e   :  { %v2906_v20 = vpop.permute.xlu0 %848  ;;  %1386 = vrot.lane.b32.xlu1 %v2730_v22, %s2223_s21 }
 0x1a0   :  { %v2910_v23 = vpop.permute.xlu1 %818  ;;  %1309 = vrot.lane.b32.xlu0 %v2799_v21, %s2224_s0  ;;  %v1359_v21 = vsel %vm830_vm2, %v1356_v15, %v1358_v37 }
 0x1a2   :  { %v2917_v26 = vpop.permute.xlu0 %869  ;;  %1408 = vrot.lane.b32.xlu1 %v1401_v1, %s2227_s24 }
 0x1a4   :  { %v2920_v30 = vpop.permute.xlu1 %891  ;;  %1338 = vrot.lane.b32.xlu0 %v1328_v49, %s2226_s23 }
 0x1a6   :  { %v2924_v33 = vpop.permute.xlu0 %921  ;;  %1437 = vrot.lane.b32.xlu1 %v1430_v31, %s2228_s25 }
 0x1a8   :  { %v2930_v34 = vpop.permute.xlu1 %889  ;;  %1368 = vrot.lane.b32.xlu0 %v1359_v21, %s2225_s22 }
 0x1aa   :  { %v2933_v35 = vpop.permute.xlu0 %943  ;;  %1460 = vrot.lane.b32.xlu1 %v1359_v21, %s2229_s26 }
 0x1ac   :  { %v2936_v39 = vpop.permute.xlu1 %919  ;;  %1388 = vrot.lane.b32.xlu0 %v2737_v29, %s2223_s21 }
 0x1ae   :  { %v2940_v40 = vpop.permute.xlu0 %941  ;;  %1410 = vrot.lane.b32.xlu1 %v1400_v62, %s2227_s24 }
 0x1b0   :  { %v1381_v43 = vpop.permute.xlu1 %1380  ;;  %1439 = vrot.lane.b32.xlu0 %v1429_v25, %s2228_s25 }
 0x1b2   :  { %v1361_v37 = vpop.permute.xlu0 %1360  ;;  %1462 = vrot.lane.b32.xlu1 %v2759_v51, %s2229_s26 }
 0x1b4   :  { %v1302_v50 = vpop.permute.xlu1 %1301 }
 0x1b5   :  { %v1316_v57 = vadd.f32 %v1302_v50, %v2696_v53 }
 0x1b6   :  { %v1331_v52 = vpop.permute.xlu0 %1330 }
 0x1b7   :  { %v1345_v61 = vadd.f32 %v1331_v52, %v1316_v57 }
 0x1b8   :  { %v2946_v54 = vpop.permute.xlu1 %1384 }
 0x1b9   :  { %v1375_v3 = vadd.f32 %v1361_v37, %v1345_v61 }
 0x1ba   :  { %v1383_v55 = vpop.permute.xlu0 %1382 }
 0x1bb   :  { %v1395_v51 = vadd.f32 %v1381_v43, %v1375_v3 }
 0x1bc   :  { %v1455_v58 = vpop.permute.xlu1 %1454 }
 0x1be   :  { %v1304_v29 = vpop.permute.xlu0 %1303 }
 0x1bf   :  { %v1317_v9 = vadd.f32 %v1304_v29, %v2701_v59 }
 0x1c0   :  { %v1333_v60 = vpop.permute.xlu1 %1332 }
 0x1c1   :  { %v1346_v45 = vadd.f32 %v1333_v60, %v1317_v9 }
 0x1c2   :  { %v1403_v0 = vpop.permute.xlu0 %1402 }
 0x1c3   :  { %v1417_v49 = vadd.f32 %v1403_v0, %v1395_v51 }
 0x1c4   :  { %v1363_v2 = vpop.permute.xlu1 %1362 }
 0x1c5   :  { %v1376_v14 = vadd.f32 %v1363_v2, %v1346_v45 }
 0x1c6   :  { %v1432_v5 = vpop.permute.xlu0 %1431 }
 0x1c7   :  { %v1446_v53 = vadd.f32 %v1432_v5, %v1417_v49  ;;  %v1396_v62 = vadd.f32 %v1383_v55, %v1376_v14 }
 0x1c8   :  { %v2950_v11 = vpop.permute.xlu1 %1305 }
 0x1c9   :  { %v1469_v17 = vadd.f32 %v1455_v58, %v1446_v53 }
 0x1ca   :  { %v2952_v12 = vpop.permute.xlu0 %1334 }
 0x1cb   :  { %v1474_v59 = vadd.f32 %v1469_v17, %v2711_v8 }
 0x1cc   :  { %v2954_v6 = vpop.permute.xlu1 %1364 }
 0x1cd   :  { %v1479_v52 = vmax.f32 %v1474_v59, 0.0 }
 0x1ce   :  { %v1457_v15 = vpop.permute.xlu0 %1456 }
 0x1cf   :  { %v1489_v0 = vrot.slane %v1479_v52, 1 }
 0x1d0   :  { %v1405_v16 = vpop.permute.xlu1 %1404 }
 0x1d1   :  { %v1418_v25 = vadd.f32 %v1405_v16, %v1396_v62 }
 0x1d2   :  { %v2956_v1 = vpop.permute.xlu0 %1406 }
 0x1d4   :  { %v1434_v31 = vpop.permute.xlu1 %1433 }
 0x1d5   :  { %v1447_v21 = vadd.f32 %v1434_v31, %v1418_v25 }
 0x1d6   :  { %v781_v43 = vpop.permute.xlu0 %780 }
 0x1d7   :  { %v1470_v37 = vadd.f32 %v1457_v15, %v1447_v21  ;;  %v795_v51 = vadd.f32 %v781_v43, %v2774_v63 }
 0x1d8   :  { %v2959_v50 = vpop.permute.xlu1 %1307 }
 0x1d9   :  { %v1475_v57 = vadd.f32 %v1470_v37, %v2719_v13  ;;  %v799_v37 = vadd.f32 %v2902_v19, %v2674_v38 }
 0x1da   :  { %v811_v29 = vpop.permute.xlu0 %810 }
 0x1db   :  { %v1480_v60 = vmax.f32 %v1475_v57, 0.0  ;;  %v825_v49 = vadd.f32 %v811_v29, %v795_v51  ;;  %v829_v43 = vadd.f32 %v2910_v23, %v799_v37 }
 0x1dc   :  { %v862_v61 = vpop.permute.xlu1 %861 }
 0x1dd   :  { %v2962_v58 = vrot.slane %v1480_v60, 1 }
 0x1de   :  { %v864_v55 = vpop.permute.xlu0 %863 }
 0x1df   :  { %v2966_v2 = vsel %vm770_vm0, %v1489_v0, %v2962_v58 }
 0x1e0   :  { %v841_v8 = vpop.permute.xlu1 %840 }
 0x1e1   :  { %v855_v14 = vadd.f32 %v841_v8, %v825_v49 }
 0x1e2   :  { %v813_v3 = vpop.permute.xlu0 %812 }
 0x1e3   :  { %v876_v16 = vadd.f32 %v862_v61, %v855_v14 }
 0x1e4   :  { %v866_v5 = vpop.permute.xlu1 %865 }
 0x1e6   :  { %v884_v9 = vpop.permute.xlu0 %883 }
 0x1e7   :  { %v898_v62 = vadd.f32 %v884_v9, %v876_v16  ;;  %v859_v9 = vadd.f32 %v2906_v20, %v829_v43 }
 0x1e8   :  { %v783_v45 = vpop.permute.xlu1 %782 }
 0x1e9   :  { %v796_v25 = vadd.f32 %v783_v45, %v2781_v7  ;;  %v880_v20 = vadd.f32 %v2917_v26, %v859_v9 }
 0x1ea   :  { %v785_v13 = vpop.permute.xlu0 %784 }
 0x1eb   :  { %v826_v52 = vadd.f32 %v813_v3, %v796_v25  ;;  %v797_v61 = vadd.f32 %v785_v13, %v2803_v24 }
 0x1ec   :  { %v843_v53 = vpop.permute.xlu1 %842 }
 0x1ed   :  { %v856_v0 = vadd.f32 %v843_v53, %v826_v52 }
 0x1ee   :  { %v787_v15 = vpop.permute.xlu0 %786 }
 0x1ef   :  { %v798_v51 = vadd.f32 %v787_v15, %v2818_v36  ;;  %v877_v24 = vadd.f32 %v864_v55, %v856_v0 }
 0x1f0   :  { %v914_v17 = vpop.permute.xlu1 %913 }
 0x1f1   :  { %v928_v59 = vadd.f32 %v914_v17, %v898_v62 }
 0x1f2   :  { %v886_v31 = vpop.permute.xlu0 %885 }
 0x1f3   :  { %v899_v49 = vadd.f32 %v886_v31, %v877_v24 }
 0x1f4   :  { %v936_v21 = vpop.permute.xlu1 %935 }
 0x1f5   :  { %v950_v57 = vadd.f32 %v936_v21, %v928_v59 }
 0x1f6   :  { %v817_v63 = vpop.permute.xlu0 %816 }
 0x1f7   :  { %v955_v29 = vadd.f32 %v950_v57, %v2812_v28  ;;  %v1318_v28 = vadd.f32 %v2950_v11, %v2708_v4  ;;  %v828_v19 = vadd.f32 %v817_v63, %v798_v51 }
 0x1f8   :  { %v815_v60 = vpop.permute.xlu1 %814 }
 0x1f9   :  { %v960_v8 = vmax.f32 %v955_v29, 0.0  ;;  %v827_v45 = vadd.f32 %v815_v60, %v797_v61  ;;  %v1347_v53 = vadd.f32 %v2952_v12, %v1318_v28  ;;  %v1319_v60 = vadd.f32 %v2959_v50, %v2714_v10 }
 0x1fa   :  { %v916_v7 = vpop.permute.xlu0 %915 }
 0x1fb   :  { %1933 = vmatmul.mubr.msk.f32.vlgmr.msra.gmra.mrb[20].mxu1 %vm965_vm5, %v960_v8  ;;  %v929_v15 = vadd.f32 %v916_v7, %v899_v49  ;;  %v1377_v25 = vadd.f32 %v2954_v6, %v1347_v53 }
 0x1fc   :  { %v845_v38 = vpop.permute.xlu1 %844  ;;  %1935 = vmatprep.mubr.msk.f32.mxu1 %vm2231_vm4, %v2232_v47  ;;  %1971 = vmatpush3.bf16.msra.mxu1 %v2826_v44  ;;  %v902_v44 = vadd.f32 %v2920_v30, %v880_v20 }
 0x1fd   :  { %v857_v23 = vadd.f32 %v845_v38, %v827_v45 }
 0x1fe   :  { %v847_v3 = vpop.permute.xlu0 %846  ;;  %v932_v12 = vadd.f32 %v2924_v33, %v902_v44 }
 0x1ff   :  { %v858_v36 = vadd.f32 %v847_v3, %v828_v19  ;;  %v878_v13 = vadd.f32 %v866_v5, %v857_v23 }
 0x200   :  { %v888_v14 = vpop.permute.xlu1 %887 }
 0x201   :  { %v879_v16 = vadd.f32 %v2899_v18, %v858_v36  ;;  %v900_v11 = vadd.f32 %v888_v14, %v878_v13 }
 0x202   :  { %v938_v17 = vpop.permute.xlu0 %937 }
 0x203   :  { %v901_v4 = vadd.f32 %v2930_v34, %v879_v16  ;;  %v951_v55 = vadd.f32 %v938_v17, %v929_v15  ;;  %v1397_v34 = vadd.f32 %v2946_v54, %v1377_v25 }
 0x204   :  { %v918_v62 = vpop.permute.xlu1 %917 }
 0x205   :  { %v931_v26 = vadd.f32 %v2936_v39, %v901_v4  ;;  %v956_v5 = vadd.f32 %v951_v55, %v2829_v48  ;;  %v930_v31 = vadd.f32 %v918_v62, %v900_v11  ;;  %v954_v48 = vadd.f32 %v2933_v35, %v932_v12 }
 0x206   :  { %v940_v59 = vpop.permute.xlu0 %939  ;;  %v1419_v33 = vadd.f32 %v2956_v1, %v1397_v34 }
 0x207   :  { %v953_v18 = vadd.f32 %v2940_v40, %v931_v26  ;;  %v961_v21 = vmax.f32 %v956_v5, 0.0  ;;  %v952_v37 = vadd.f32 %v940_v59, %v930_v31 }
 0x208   :  { %v1337_v30 = vpop.permute.xlu1 %1336 }
 0x209   :  { %v957_v52 = vadd.f32 %v952_v37, %v2676_v41  ;;  %1936 = vmatmul.mubr.msk.f32.gmra.mrb[22].mxu1 %vm965_vm5, %v961_v21  ;;  %v958_v6 = vadd.f32 %v953_v18, %v2683_v46  ;;  %v959_v41 = vadd.f32 %v954_v48, %v2698_v56  ;;  %v1348_v0 = vadd.f32 %v1337_v30, %v1319_v60 }
 0x20a   :  { %v1436_v39 = vpop.permute.xlu0 %1435  ;;  %1938 = vmatprep.mubr.msk.f32.mxu1 %vm2231_vm4, %v2232_v47 }
 0x20b   :  { %v962_v40 = vmax.f32 %v957_v52, 0.0  ;;  %v1448_v63 = vadd.f32 %v1436_v39, %v1419_v33  ;;  %v963_v43 = vmax.f32 %v958_v6, 0.0  ;;  %v964_v61 = vmax.f32 %v959_v41, 0.0 }
 0x20c   :  { %v1367_v57 = vpop.permute.xlu1 %1366 }
 0x20d   :  { %1939 = vmatmul.mubr.msk.f32.gmra.mrb[24].mxu1 %vm965_vm5, %v962_v40  ;;  %v1378_v9 = vadd.f32 %v1367_v57, %v1348_v0 }
 0x20e   :  { %v1459_v54 = vpop.permute.xlu0 %1458  ;;  %1941 = vmatprep.mubr.msk.f32.mxu1 %vm2231_vm4, %v2232_v47 }
 0x20f   :  { %v1471_v46 = vadd.f32 %v1459_v54, %v1448_v63 }
 0x210   :  { %v1387_v29 = vpop.permute.xlu1 %1386 }
 0x211   :  { %v1476_v35 = vadd.f32 %v1471_v46, %v2734_v27  ;;  %1942 = vmatmul.mubr.msk.f32.gmra.mrb[26].mxu1 %vm965_vm5, %v963_v43  ;;  %v1398_v10 = vadd.f32 %v1387_v29, %v1378_v9 }
 0x212   :  { %v1310_v1 = vpop.permute.xlu0 %1309  ;;  %1944 = vmatprep.mubr.msk.f32.mxu1 %vm2231_vm4, %v2232_v47 }
 0x213   :  { %v1481_v8 = vmax.f32 %v1476_v35, 0.0  ;;  %v1320_v45 = vadd.f32 %v1310_v1, %v2730_v22 }
 0x214   :  { %v1409_v7 = vpop.permute.xlu1 %1408 }
 0x215   :  { %v1492_v56 = vrot.slane %v1481_v8, 1  ;;  %1945 = vmatmul.mubr.msk.f32.gmra.mrb[28].mxu1 %vm965_vm5, %v964_v61  ;;  %v1420_v38 = vadd.f32 %v1409_v7, %v1398_v10 }
 0x216   :  { %v1339_v51 = vpop.permute.xlu0 %1338  ;;  %1951 = vmatprep.mubr.msk.f32.mxu1 %vm2231_vm4, %v2232_v47 }
 0x217   :  { %v1493_v27 = vsel %vm770_vm0, %v2962_v58, %v1492_v56  ;;  %v1349_v24 = vadd.f32 %v1339_v51, %v1320_v45 }
 0x218   :  { %v1438_v50 = vpop.permute.xlu1 %1437 }
 0x219   :  { %1952 = vmatmul.mubr.msk.f32.vlgmr.msra.gmra.mrb[30].mxu1 %vm965_vm5, %v2966_v2  ;;  %v1449_v19 = vadd.f32 %v1438_v50, %v1420_v38 }
 0x21a   :  { %v1369_v28 = vpop.permute.xlu0 %1368  ;;  %1954 = vmatprep.mubr.msk.f32.mxu1 %vm2231_vm4, %v2232_v47 }
 0x21b   :  { %v1379_v3 = vadd.f32 %v1369_v28, %v1349_v24 }
 0x21c   :  { %v1461_v23 = vpop.permute.xlu1 %1460 }
 0x21d   :  { %v1472_v20 = vadd.f32 %v1461_v23, %v1449_v19  ;;  %1955 = vmatmul.mubr.msk.f32.gmra.mrb[32].mxu1 %vm965_vm5, %v1493_v27 }
 0x21e   :  { %v1389_v49 = vpop.permute.xlu0 %1388  ;;  %1957 = vmatprep.mubr.msk.f32.mxu1 %vm2231_vm4, %v2232_v47 }
 0x21f   :  { %v1477_v22 = vadd.f32 %v1472_v20, %v2740_v32  ;;  %v1399_v58 = vadd.f32 %v1389_v49, %v1379_v3 }
 0x220   :  { %v1411_v36 = vpop.permute.xlu1 %1410 }
 0x221   :  { %v1482_v2 = vmax.f32 %v1477_v22, 0.0  ;;  %v1421_v13 = vadd.f32 %v1411_v36, %v1399_v58 }
 0x222   :  { %v1440_v14 = vpop.permute.xlu0 %1439 }
 0x223   :  { %v1494_v53 = vrot.slane %v1482_v2, 1  ;;  %v1450_v15 = vadd.f32 %v1440_v14, %v1421_v13 }
 0x224   :  { %v1463_v16 = vpop.permute.xlu1 %1462 }
 0x225   :  { %v1473_v17 = vadd.f32 %v1463_v16, %v1450_v15  ;;  %v1495_v44 = vsel %vm770_vm0, %v1492_v56, %v1494_v53 }
 0x226   :  { %1958 = vmatmul.mubr.msk.f32.gmra.mrb[34].mxu1 %vm965_vm5, %v1495_v44 }
 0x227   :  { %v1478_v4 = vadd.f32 %v1473_v17, %v2749_v42  ;;  %1960 = vmatprep.mubr.msk.f32.mxu1 %vm2231_vm4, %v2232_v47 }
 0x229   :  { %v1483_v11 = vmax.f32 %v1478_v4, 0.0 }
 0x22b   :  { %v1496_v32 = vrot.slane %v1483_v11, 1 }
 0x22d   :  { %v1497_v55 = vsel %vm770_vm0, %v1494_v53, %v1496_v32 }
 0x22e   :  { %1961 = vmatmul.mubr.msk.f32.gmra.mrb[36].mxu1 %vm965_vm5, %v1497_v55 }
 0x22f   :  { %1963 = vmatprep.mubr.msk.f32.mxu1 %vm2231_vm4, %v2232_v47 }
 0x232   :  { %1964 = vmatmul.mubr.msk.f32.gmra.mrb[38].mxu1 %vm965_vm5, %v1496_v32 }
 0x2ce   :  { %v3035_v62 = vpop.f32.mrb[20].mxu1 }
 0x2cf   :  { %v1934_v25 = vpop.f32.mrb[21].mxu1  ;;  %v1074_v26 = vrot.slane %v3035_v62, 1  ;;  %v1091_v42 = vrot.slane %v3035_v62, 2  ;;  %v1108_v31 = vrot.slane %v3035_v62, 7 }
 0x2dc   :  { %v3039_v5 = vpop.f32.mrb[22].mxu1 }
 0x2dd   :  { %1126 = vrot.lane.b32.xlu0 %v3039_v5, %s2226_s23  ;;  %v1937_v59 = vpop.f32.mrb[23].mxu1  ;;  %v1075_v12 = vrot.slane %v3039_v5, 1  ;;  %v1092_v47 = vrot.slane %v3039_v5, 2  ;;  %v1109_v18 = vrot.slane %v3039_v5, 7  ;;  %v1152_v52 = vrot.slane %v3039_v5, 6 }
 0x2de   :  { %v2237_v59 = vmov 1  }
 0x2df   :  { %v1076_v21 = vsel %vm770_vm0, %v1074_v26, %v1075_v12  ;;  %v1093_v37 = vsel %vm800_vm3, %v1091_v42, %v1092_v47  ;;  %v1110_v30 = vsel %vm830_vm2, %v1108_v31, %v1109_v18  ;;  %2048 = vset.pattern.permute.xlu1 %v2237_v59 }
 0x2e0   :  { %v3050_v34 = vpop.f32.mrb[24].mxu1 }
 0x2e1   :  { %1079 = vrot.lane.b32.xlu0 %v1076_v21, %s2233_s2  ;;  %1184 = vrot.lane.b32.xlu1 %v3050_v34, %s2223_s21  ;;  %v1940_v6 = vpop.f32.mrb[25].mxu1  ;;  %v1077_v39 = vrot.slane %v3050_v34, 1  ;;  %v1153_v48 = vrot.slane %v3050_v34, 6  ;;  %v1111_v33 = vrot.slane %v3050_v34, 7  ;;  %v1094_v40 = vrot.slane %v3050_v34, 2 }
 0x2e3   :  { %v1078_v57 = vsel %vm770_vm0, %v1075_v12, %v1077_v39  ;;  %v1154_v63 = vsel %vm903_vm1, %v1152_v52, %v1153_v48  ;;  %v3063_v54 = vsel %vm830_vm2, %v1109_v18, %v1111_v33  ;;  %v1095_v41 = vsel %vm800_vm3, %v1092_v47, %v1094_v40 }
 0x2e4   :  { %v3066_v46 = vpop.f32.mrb[26].mxu1  ;;  %v2238_v12 = vmov 0  }
 0x2e5   :  { %1096 = vrot.lane.b32.xlu0 %v1093_v37, %s2224_s0  ;;  %1140 = vrot.lane.b32.xlu1 %v1078_v57, %s2234_s6  ;;  %v1943_v43 = vpop.f32.mrb[27].mxu1  ;;  %v1138_v29 = vrot.slane %v3066_v46, 1  ;;  %v1155_v60 = vrot.slane %v3066_v46, 6  ;;  %v1169_v35 = vrot.slane %v3066_v46, 7 }
 0x2e6   :  { %2047 = vset.pattern.permute.xlu0 %v2238_v12 }
 0x2e7   :  { %v1139_v1 = vsel %vm770_vm0, %v1077_v39, %v1138_v29  ;;  %v1156_v61 = vsel %vm903_vm1, %v1153_v48, %v1155_v60  ;;  %v1170_v0 = vsel %vm830_vm2, %v1111_v33, %v1169_v35 }
 0x2e8   :  { %v3082_v8 = vpop.f32.mrb[28].mxu1 }
 0x2e9   :  { %1113 = vrot.lane.b32.xlu0 %v1110_v30, %s2235_s7  ;;  %1157 = vrot.lane.b32.xlu1 %v1154_v63, %s2225_s22  ;;  %v1946_v7 = vpop.f32.mrb[29].mxu1 }
 0x2ec   :  { %v3086_v9 = vpop.f32.mrb[30].mxu1 }
 0x2ed   :  { %1128 = vrot.lane.b32.xlu0 %v3050_v34, %s2226_s23  ;;  %1171 = vrot.lane.b32.xlu1 %v3063_v54, %s2236_s1  ;;  %v1953_v56 = vpop.f32.mrb[31].mxu1  ;;  %v1601_v51 = vrot.slane %v3086_v9, 1  ;;  %v1618_v10 = vrot.slane %v3086_v9, 2  ;;  %v1635_v50 = vrot.slane %v3086_v9, 7 }
 0x2f0   :  { %v3094_v27 = vpop.f32.mrb[32].mxu1 }
 0x2f1   :  { %1083 = vrot.lane.b32.xlu0 %v1077_v39, %s2233_s2  ;;  %1186 = vrot.lane.b32.xlu1 %v3066_v46, %s2223_s21  ;;  %v1956_v45 = vpop.f32.mrb[33].mxu1  ;;  %v1602_v38 = vrot.slane %v3094_v27, 1  ;;  %v1619_v28 = vrot.slane %v3094_v27, 2  ;;  %v1636_v24 = vrot.slane %v3094_v27, 7  ;;  %v1679_v49 = vrot.slane %v3094_v27, 6 }
 0x2f3   :  { %v1603_v19 = vsel %vm770_vm0, %v1601_v51, %v1602_v38  ;;  %v1620_v23 = vsel %vm800_vm3, %v1618_v10, %v1619_v28  ;;  %v1637_v3 = vsel %vm830_vm2, %v1635_v50, %v1636_v24 }
 0x2f5   :  { %1100 = vrot.lane.b32.xlu0 %v1094_v40, %s2224_s0  ;;  %1142 = vrot.lane.b32.xlu1 %v1139_v1, %s2234_s6 }
 0x2f9   :  { %1117 = vrot.lane.b32.xlu0 %v1111_v33, %s2235_s7  ;;  %1159 = vrot.lane.b32.xlu1 %v1156_v61, %s2225_s22  ;;  %v3110_v20 = vpop.f32.mrb[34].mxu1 }
 0x2fa   :  { %v1959_v22 = vpop.f32.mrb[35].mxu1  ;;  %v1604_v58 = vrot.slane %v3110_v20, 1  ;;  %v1621_v36 = vrot.slane %v3110_v20, 2  ;;  %v1638_v2 = vrot.slane %v3110_v20, 7  ;;  %v1680_v13 = vrot.slane %v3110_v20, 6 }
 0x2fc   :  { %v1605_v14 = vsel %vm770_vm0, %v1602_v38, %v1604_v58  ;;  %v1681_v53 = vsel %vm903_vm1, %v1679_v49, %v1680_v13  ;;  %v1639_v15 = vsel %vm830_vm2, %v1636_v24, %v1638_v2  ;;  %v1622_v16 = vsel %vm800_vm3, %v1619_v28, %v1621_v36 }
 0x2fd   :  { %1081 = vrot.lane.b32.xlu0 %v1078_v57, %s2233_s2  ;;  %1173 = vrot.lane.b32.xlu1 %v1170_v0, %s2236_s1 }
 0x301   :  { %1098 = vrot.lane.b32.xlu0 %v1095_v41, %s2224_s0  ;;  %1653 = vrot.lane.b32.xlu1 %v3094_v27, %s2226_s23  ;;  %v1589_v17 = vpop.f32.mrb[36].mxu1 }
 0x302   :  { %v1962_v44 = vpop.f32.mrb[37].mxu1  ;;  %v1665_v4 = vrot.slane %v1589_v17, 1  ;;  %v1682_v11 = vrot.slane %v1589_v17, 6  ;;  %v1696_v32 = vrot.slane %v1589_v17, 7 }
 0x304   :  { %v1666_v55 = vsel %vm770_vm0, %v1604_v58, %v1665_v4  ;;  %v1683_v25 = vsel %vm903_vm1, %v1680_v13, %v1682_v11  ;;  %v1697_v26 = vsel %vm830_vm2, %v1638_v2, %v1696_v32 }
 0x305   :  { %1115 = vrot.lane.b32.xlu0 %v3063_v54, %s2235_s7  ;;  %1606 = vrot.lane.b32.xlu1 %v1603_v19, %s2233_s2  ;;  %v1594_v42 = vpop.f32.mrb[38].mxu1 }
 0x306   :  { %v1965_v31 = vpop.f32.mrb[39].mxu1 }
 0x309   :  { %1130 = vrot.lane.b32.xlu0 %v3066_v46, %s2226_s23  ;;  %1623 = vrot.lane.b32.xlu1 %v1620_v23, %s2224_s0 }
 0x30d   :  { %1640 = vrot.lane.b32.xlu1 %v1637_v3, %s2235_s7  ;;  %1655 = vrot.lane.b32.xlu0 %v3110_v20, %s2226_s23 }
 0x311   :  { %1711 = vrot.lane.b32.xlu1 %v3110_v20, %s2223_s21  ;;  %1610 = vrot.lane.b32.xlu0 %v1604_v58, %s2233_s2 }
 0x315   :  { %1627 = vrot.lane.b32.xlu0 %v1621_v36, %s2224_s0  ;;  %1667 = vrot.lane.b32.xlu1 %v1605_v14, %s2234_s6 }
 0x319   :  { %1644 = vrot.lane.b32.xlu0 %v1638_v2, %s2235_s7  ;;  %1684 = vrot.lane.b32.xlu1 %v1681_v53, %s2225_s22 }
 0x31d   :  { %1698 = vrot.lane.b32.xlu1 %v1639_v15, %s2236_s1  ;;  %1608 = vrot.lane.b32.xlu0 %v1605_v14, %s2233_s2 }
 0x321   :  { %1625 = vrot.lane.b32.xlu0 %v1622_v16, %s2224_s0  ;;  %1713 = vrot.lane.b32.xlu1 %v1589_v17, %s2223_s21 }
 0x325   :  { %1642 = vrot.lane.b32.xlu0 %v1639_v15, %s2235_s7  ;;  %1671 = vrot.lane.b32.xlu1 %v1665_v4, %s2234_s6 }
 0x329   :  { %1144 = vrot.lane.b32.xlu0 %v1138_v29, %s2234_s6  ;;  %1669 = vrot.lane.b32.xlu1 %v1666_v55, %s2234_s6 }
 0x32d   :  { %1161 = vrot.lane.b32.xlu0 %v1155_v60, %s2225_s22  ;;  %1686 = vrot.lane.b32.xlu1 %v1683_v25, %s2225_s22 }
 0x331   :  { %1657 = vrot.lane.b32.xlu0 %v1589_v17, %s2226_s23  ;;  %1700 = vrot.lane.b32.xlu1 %v1697_v26, %s2236_s1 }
 0x335   :  { %1175 = vrot.lane.b32.xlu0 %v1169_v35, %s2236_s1  ;;  %1688 = vrot.lane.b32.xlu1 %v1682_v11, %s2225_s22 }
 0x339   :  { %1188 = vrot.lane.b32.xlu0 %v3082_v8, %s2223_s21  ;;  %1702 = vrot.lane.b32.xlu1 %v1696_v32, %s2236_s1 }
 0x33d   :  { %1715 = vrot.lane.b32.xlu1 %v1594_v42, %s2223_s21 }
 0x34f   :  { %v1127_v47 = vpop.permute.xlu0 %1126 }
 0x353   :  { %v1080_v18 = vpop.permute.xlu0 %1079  ;;  %v1185_v21 = vpop.permute.xlu1 %1184 }
 0x354   :  { %v1088_v52 = vadd.f32 %v1080_v18, %v3035_v62 }
 0x357   :  { %v1097_v37 = vpop.permute.xlu0 %1096  ;;  %v1141_v30 = vpop.permute.xlu1 %1140 }
 0x358   :  { %v1105_v6 = vadd.f32 %v1097_v37, %v1088_v52 }
 0x35b   :  { %v1114_v39 = vpop.permute.xlu0 %1113  ;;  %v1158_v48 = vpop.permute.xlu1 %1157 }
 0x35c   :  { %v1122_v33 = vadd.f32 %v1114_v39, %v1105_v6 }
 0x35e   :  { %v1135_v40 = vadd.f32 %v1127_v47, %v1122_v33 }
 0x35f   :  { %v1129_v57 = vpop.permute.xlu0 %1128  ;;  %v1172_v63 = vpop.permute.xlu1 %1171 }
 0x360   :  { %v1149_v46 = vadd.f32 %v1141_v30, %v1135_v40 }
 0x362   :  { %v1166_v60 = vadd.f32 %v1158_v48, %v1149_v46 }
 0x363   :  { %v3172_v54 = vpop.permute.xlu0 %1083  ;;  %v1187_v41 = vpop.permute.xlu1 %1186 }
 0x364   :  { %v1180_v61 = vadd.f32 %v1172_v63, %v1166_v60 }
 0x366   :  { %v1193_v8 = vadd.f32 %v1185_v21, %v1180_v61 }
 0x367   :  { %v3174_v43 = vpop.permute.xlu0 %1100  ;;  %v1143_v29 = vpop.permute.xlu1 %1142 }
 0x368   :  { %v1196_v51 = vmax.f32 %v1193_v8, 0.0 }
 0x36a   :  { %v1200_v28 = vrot.slane %v1196_v51, 1  ;;  %v1203_v58 = vrot.slane %v1196_v51, 2  ;;  %v1206_v15 = vrot.slane %v1196_v51, 7 }
 0x36b   :  { %v3176_v35 = vpop.permute.xlu0 %1117  ;;  %v1160_v1 = vpop.permute.xlu1 %1159 }
 0x36c   :  { %v1202_v49 = vmax.f32 %v1196_v51, %v1200_v28 }
 0x36e   :  { %v1205_v14 = vmax.f32 %v1202_v49, %v1203_v58 }
 0x36f   :  { %v1082_v62 = vpop.permute.xlu0 %1081  ;;  %v1174_v0 = vpop.permute.xlu1 %1173 }
 0x370   :  { %v1089_v10 = vadd.f32 %v1082_v62, %v3039_v5  ;;  %v1208_v32 = vmax.f32 %v1205_v14, %v1206_v15 }
 0x373   :  { %v1099_v7 = vpop.permute.xlu0 %1098  ;;  %v1654_v56 = vpop.permute.xlu1 %1653 }
 0x374   :  { %v1106_v50 = vadd.f32 %v1099_v7, %v1089_v10  ;;  %v1090_v10 = vadd.f32 %v3172_v54, %v3050_v34 }
 0x376   :  { %v1107_v28 = vadd.f32 %v3174_v43, %v1090_v10 }
 0x377   :  { %v1116_v45 = vpop.permute.xlu0 %1115  ;;  %v1607_v38 = vpop.permute.xlu1 %1606 }
 0x378   :  { %v1123_v24 = vadd.f32 %v1116_v45, %v1106_v50  ;;  %v1615_v5 = vadd.f32 %v1607_v38, %v3086_v9 }
 0x37a   :  { %v1136_v19 = vadd.f32 %v1129_v57, %v1123_v24 }
 0x37b   :  { %v3179_v23 = vpop.permute.xlu0 %1130  ;;  %v1624_v3 = vpop.permute.xlu1 %1623 }
 0x37c   :  { %v1150_v22 = vadd.f32 %v1143_v29, %v1136_v19  ;;  %v1632_v11 = vadd.f32 %v1624_v3, %v1615_v5  ;;  %v1124_v3 = vadd.f32 %v3176_v35, %v1107_v28 }
 0x37e   :  { %v1167_v36 = vadd.f32 %v1160_v1, %v1150_v22 }
 0x37f   :  { %v1641_v2 = vpop.permute.xlu1 %1640  ;;  %v1656_v13 = vpop.permute.xlu0 %1655 }
 0x380   :  { %v1181_v53 = vadd.f32 %v1174_v0, %v1167_v36  ;;  %v1649_v55 = vadd.f32 %v1641_v2, %v1632_v11 }
 0x382   :  { %v1194_v16 = vadd.f32 %v1187_v41, %v1181_v53  ;;  %v1662_v21 = vadd.f32 %v1654_v56, %v1649_v55 }
 0x383   :  { %v1712_v17 = vpop.permute.xlu1 %1711  ;;  %v1611_v44 = vpop.permute.xlu0 %1610 }
 0x384   :  { %v1197_v4 = vmax.f32 %v1194_v16, 0.0  ;;  %v1617_v50 = vadd.f32 %v1611_v44, %v3110_v20 }
 0x386   :  { %v1209_v25 = vmax.f32 %v1208_v32, %v1197_v4  ;;  %v1211_v26 = vrot.slane %v1197_v4, 1  ;;  %v1214_v18 = vrot.slane %v1197_v4, 6  ;;  %v1217_v30 = vrot.slane %v1197_v4, 7 }
 0x387   :  { %v1628_v42 = vpop.permute.xlu0 %1627  ;;  %v1668_v31 = vpop.permute.xlu1 %1667 }
 0x388   :  { %v1213_v47 = vmax.f32 %v1209_v25, %v1211_v26  ;;  %v1676_v39 = vadd.f32 %v1668_v31, %v1662_v21  ;;  %v1634_v24 = vadd.f32 %v1628_v42, %v1617_v50 }
 0x38a   :  { %v1216_v37 = vmax.f32 %v1213_v47, %v1214_v18 }
 0x38b   :  { %v1645_v52 = vpop.permute.xlu0 %1644  ;;  %v1685_v6 = vpop.permute.xlu1 %1684 }
 0x38c   :  { %v1219_v48 = vmax.f32 %v1216_v37, %v1217_v30  ;;  %v1693_v9 = vadd.f32 %v1685_v6, %v1676_v39  ;;  %v1651_v49 = vadd.f32 %v1645_v52, %v1634_v24 }
 0x38f   :  { %v1699_v33 = vpop.permute.xlu1 %1698  ;;  %v1609_v40 = vpop.permute.xlu0 %1608 }
 0x390   :  { %v1707_v57 = vadd.f32 %v1699_v33, %v1693_v9  ;;  %v1616_v29 = vadd.f32 %v1609_v40, %v3094_v27  ;;  %v2239_v40 = vmov 3  }
 0x392   :  { %v1720_v46 = vadd.f32 %v1712_v17, %v1707_v57  ;;  %v2240_v57 = vmov 2  }
 0x393   :  { %v1626_v63 = vpop.permute.xlu0 %1625  ;;  %v1714_v41 = vpop.permute.xlu1 %1713 }
 0x394   :  { %v1633_v60 = vadd.f32 %v1626_v63, %v1616_v29  ;;  %v1723_v62 = vmax.f32 %v1720_v46, 0.0  ;;  %v2241_v63 = vmov 6   ;;  %v2244_v46 = vmov 7  }
 0x396   :  { %v1727_v56 = vrot.slane %v1723_v62, 1  ;;  %v1730_v22 = vrot.slane %v1723_v62, 2  ;;  %v1733_v20 = vrot.slane %v1723_v62, 7 }
 0x397   :  { %v1643_v1 = vpop.permute.xlu0 %1642  ;;  %v1672_v61 = vpop.permute.xlu1 %1671 }
 0x398   :  { %v1650_v0 = vadd.f32 %v1643_v1, %v1633_v60  ;;  %v1729_v27 = vmax.f32 %v1723_v62, %v1727_v56  ;;  %v764_v56 = vld [vmem:[%s3213_s4] sm:$0x1] }
 0x39a   :  { %v1663_v51 = vadd.f32 %v1656_v13, %v1650_v0  ;;  %v1137_v13 = vadd.f32 %v3179_v23, %v1124_v3  ;;  %v1732_v14 = vmax.f32 %v1729_v27, %v1730_v22  ;;  %v763_v0 = vld [vmem:[%s3212_s3] sm:$0xff]  ;;  %s2245_s3 = smov [#allocation2]  }
 0x39b   :  { %v1145_v8 = vpop.permute.xlu0 %1144  ;;  %v1670_v7 = vpop.permute.xlu1 %1669  ;;  %v1233_v10 = vrot.slane %v763_v0, 1  ;;  %v1241_v28 = vrot.slane %v763_v0, 2  ;;  %s1804_s4 = sshll.u32 %s2245_s3, 4  ;;  %s1805_s4 = int_to_ptr.vmem [resolvable:$true] %s1804_s4 }
 0x39c   :  { %v1677_v19 = vadd.f32 %v1670_v7, %v1663_v51  ;;  %v1151_v53 = vadd.f32 %v1145_v8, %v1137_v13  ;;  %v1735_v4 = vmax.f32 %v1732_v14, %v1733_v20  ;;  %s2199_s12 = scalar_lea.vmem %s1805_s4, 32  ;;  %p2204_p1 = scmp.lt.s32.totalorder %s1805_s4, %s1805_s4 }
 0x39d   :  { %p2200_p0 = scmp.ne.s32.totalorder %s1805_s4, %s2199_s12  ;;  %p2205_p2 = scmp.lt.s32.totalorder %s2199_s12, %s2199_s12 }
 0x39f   :  { %v1162_v45 = vpop.permute.xlu0 %1161  ;;  %v1687_v38 = vpop.permute.xlu1 %1686  ;;  %p2206_p3 = por %p2205_p2, %p2204_p1 }
 0x3a0   :  { %v1694_v58 = vadd.f32 %v1687_v38, %v1677_v19  ;;  %v1168_v5 = vadd.f32 %v1162_v45, %v1151_v53 }
 0x3a1   :  { %p2207_p4 = pnand %p2206_p3, %p2200_p0 }
 0x3a3   :  { %v1658_v36 = vpop.permute.xlu0 %1657  ;;  %v1701_v2 = vpop.permute.xlu1 %1700 }
 0x3a4   :  { %v1664_v34 = vadd.f32 %v1658_v36, %v1651_v49  ;;  %v1708_v54 = vadd.f32 %v1701_v2, %v1694_v58  ;;  %v1249_v36 = vrot.slane %v763_v0, 3 }
 0x3a6   :  { %v1721_v15 = vadd.f32 %v1714_v41, %v1708_v54  ;;  %v1678_v44 = vadd.f32 %v1672_v61, %v1664_v34  ;;  %v2242_v41 = vmov 4   ;;  %v1257_v54 = vrot.slane %v763_v0, 4 }
 0x3a7   :  { %v1176_v16 = vpop.permute.xlu0 %1175  ;;  %v1689_v43 = vpop.permute.xlu1 %1688 }
 0x3a8   :  { %v1724_v17 = vmax.f32 %v1721_v15, 0.0  ;;  %v1182_v35 = vadd.f32 %v1176_v16, %v1168_v5  ;;  %v1695_v26 = vadd.f32 %v1689_v43, %v1678_v44  ;;  %v1265_v16 = vrot.slane %v763_v0, 5 }
 0x3aa   :  { %v1736_v11 = vmax.f32 %v1735_v4, %v1724_v17  ;;  %v1738_v32 = vrot.slane %v1724_v17, 1  ;;  %v1741_v31 = vrot.slane %v1724_v17, 6  ;;  %v1744_v37 = vrot.slane %v1724_v17, 7 }
 0x3ab   :  { %v1189_v55 = vpop.permute.xlu0 %1188  ;;  %v1703_v25 = vpop.permute.xlu1 %1702 }
 0x3ac   :  { %v1195_v42 = vadd.f32 %v1189_v55, %v1182_v35  ;;  %v1740_v23 = vmax.f32 %v1736_v11, %v1738_v32  ;;  %v1709_v18 = vadd.f32 %v1703_v25, %v1695_v26  ;;  %v1273_v32 = vrot.slane %v763_v0, 6 }
 0x3ad   :  { %v1281_v55 = vrot.slane %v763_v0, 7 }
 0x3ae   :  { %v1198_v47 = vmax.f32 %v1195_v42, 0.0  ;;  %v1743_v21 = vmax.f32 %v1740_v23, %v1741_v31 }
 0x3af   :  { %v1716_v30 = vpop.permute.xlu1 %1715 }
 0x3b0   :  { %v1220_v52 = vmax.f32 %v1219_v48, %v1198_v47  ;;  %v1746_v6 = vmax.f32 %v1743_v21, %v1744_v37  ;;  %v1722_v39 = vadd.f32 %v1716_v30, %v1709_v18  ;;  %v2243_v48 = vmov 5  }
 0x3b2   :  { %v1725_v9 = vmax.f32 %v1722_v39, 0.0  ;;  %1223 = vperm.xlu0 %2047, %v1220_v52   ;;  %1229 = vperm.xlu1 %2048, %v1220_v52  }
 0x3b4   :  { %v1747_v33 = vmax.f32 %v1746_v6, %v1725_v9 }
 0x3b6   :  { %2050 = vset.pattern.permute.xlu0 %v2239_v40  ;;  %2049 = vset.pattern.permute.xlu1 %v2240_v57 }
 0x3b7   :  { %1246 = vperm.xlu0 %2050, %v1220_v52   ;;  %1238 = vperm.xlu1 %2049, %v1220_v52  }
 0x3bb   :  { %2053 = vset.pattern.permute.xlu0 %v2241_v63  ;;  %2051 = vset.pattern.permute.xlu1 %v2242_v41 }
 0x3bc   :  { %1270 = vperm.xlu0 %2053, %v1220_v52   ;;  %1254 = vperm.xlu1 %2051, %v1220_v52  }
 0x3c0   :  { %2055 = vset.pattern.permute.xlu0 %v2237_v59  ;;  %2052 = vset.pattern.permute.xlu1 %v2243_v48 }
 0x3c1   :  { %1262 = vperm.xlu1 %2052, %v1220_v52   ;;  %1756 = vperm.xlu0 %2055, %v1747_v33  }
 0x3c5   :  { %2054 = vset.pattern.permute.xlu1 %v2238_v12  ;;  %2058 = vset.pattern.permute.xlu0 %v2242_v41 }
 0x3c6   :  { %1774 = vperm.xlu0 %2058, %v1747_v33   ;;  %1750 = vperm.xlu1 %2054, %v1747_v33  }
 0x3ca   :  { %2062 = vset.pattern.permute.xlu0 %v2244_v46  ;;  %2056 = vset.pattern.permute.xlu1 %v2240_v57 }
 0x3cb   :  { %1792 = vperm.xlu0 %2062, %v1747_v33   ;;  %1762 = vperm.xlu1 %2056, %v1747_v33  }
 0x3cf   :  { %2057 = vset.pattern.permute.xlu1 %v2239_v40 }
 0x3d0   :  { %1768 = vperm.xlu1 %2057, %v1747_v33  }
 0x3d4   :  { %2059 = vset.pattern.permute.xlu1 %v2243_v48 }
 0x3d5   :  { %1780 = vperm.xlu1 %2059, %v1747_v33  }
 0x3d9   :  { %2060 = vset.pattern.permute.xlu1 %v2241_v63 }
 0x3da   :  { %1786 = vperm.xlu1 %2060, %v1747_v33  }
 0x3de   :  { %2061 = vset.pattern.permute.xlu1 %v2244_v46 }
 0x3df   :  { %1278 = vperm.xlu1 %2061, %v1220_v52  }
 0x431   :  { %v1230_v59 = vpop.permute.xlu1 %1229  ;;  %v1224_v29 = vpop.permute.xlu0 %1223 }
 0x432   :  { %v1226_v8 = vmul.f32 %v1224_v29, %v763_v0  ;;  %v1235_v19 = vmul.f32 %v1233_v10, %v1230_v59 }
 0x434   :  { %v1227_v38 = vadd.f32 %v1226_v8, %v764_v56 }
 0x436   :  { %v1239_v60 = vpop.permute.xlu1 %1238  ;;  %v1247_v12 = vpop.permute.xlu0 %1246  ;;  %v1236_v22 = vadd.f32 %v1235_v19, %v1227_v38 }
 0x437   :  { %v1243_v58 = vmul.f32 %v1241_v28, %v1239_v60  ;;  %v1251_v15 = vmul.f32 %v1249_v36, %v1247_v12 }
 0x439   :  { %v1244_v34 = vadd.f32 %v1243_v58, %v1236_v22 }
 0x43b   :  { %v1255_v1 = vpop.permute.xlu1 %1254  ;;  %v1271_v62 = vpop.permute.xlu0 %1270  ;;  %v1252_v17 = vadd.f32 %v1251_v15, %v1244_v34 }
 0x43c   :  { %v1259_v44 = vmul.f32 %v1257_v54, %v1255_v1  ;;  %v1275_v37 = vmul.f32 %v1273_v32, %v1271_v62 }
 0x43e   :  { %v1260_v25 = vadd.f32 %v1259_v44, %v1252_v17 }
 0x440   :  { %v1263_v61 = vpop.permute.xlu1 %1262  ;;  %v1757_v50 = vpop.permute.xlu0 %1756 }
 0x441   :  { %v1759_v24 = vmul.f32 %v1757_v50, %v1233_v10  ;;  %v1267_v11 = vmul.f32 %v1265_v16, %v1263_v61 }
 0x443   :  { %v1268_v47 = vadd.f32 %v1267_v11, %v1260_v25 }
 0x445   :  { %v1751_v7 = vpop.permute.xlu1 %1750  ;;  %v1775_v20 = vpop.permute.xlu0 %1774  ;;  %v1276_v6 = vadd.f32 %v1275_v37, %v1268_v47 }
 0x446   :  { %v1753_v51 = vmul.f32 %v1751_v7, %v763_v0  ;;  %v1777_v43 = vmul.f32 %v1775_v20, %v1257_v54 }
 0x448   :  { %v1754_v45 = vadd.f32 %v1753_v51, %v764_v56 }
 0x44a   :  { %v1763_v27 = vpop.permute.xlu1 %1762  ;;  %v1760_v3 = vadd.f32 %v1759_v24, %v1754_v45  ;;  %v1793_v26 = vpop.permute.xlu0 %1792 }
 0x44b   :  { %v1765_v49 = vmul.f32 %v1763_v27, %v1241_v28  ;;  %v1795_v18 = vmul.f32 %v1793_v26, %v1281_v55 }
 0x44d   :  { %v1766_v13 = vadd.f32 %v1765_v49, %v1760_v3 }
 0x44f   :  { %v1769_v2 = vpop.permute.xlu1 %1768 }
 0x450   :  { %v1771_v14 = vmul.f32 %v1769_v2, %v1249_v36 }
 0x452   :  { %v1772_v53 = vadd.f32 %v1771_v14, %v1766_v13 }
 0x454   :  { %v1781_v5 = vpop.permute.xlu1 %1780  ;;  %v1778_v4 = vadd.f32 %v1777_v43, %v1772_v53 }
 0x455   :  { %v1783_v35 = vmul.f32 %v1781_v5, %v1265_v16 }
 0x457   :  { %v1784_v23 = vadd.f32 %v1783_v35, %v1778_v4 }
 0x459   :  { %v1787_v42 = vpop.permute.xlu1 %1786 }
 0x45a   :  { %v1789_v31 = vmul.f32 %v1787_v42, %v1273_v32 }
 0x45c   :  { %v1790_v21 = vadd.f32 %v1789_v31, %v1784_v23 }
 0x45e   :  { %v1796_v30 = vadd.f32 %v1795_v18, %v1790_v21  ;;  %v1279_v52 = vpop.permute.xlu1 %1278 }
 0x45f   :  { %v1283_v39 = vmul.f32 %v1281_v55, %v1279_v52 }
 0x460   :  { %1797 = vst.msk [vmem:[#allocation2 + $0x1] sm:$0x1] %vm1285_vm6, %v1796_v30 }
 0x461   :  { %v1284_v9 = vadd.f32 %v1283_v39, %v1276_v6 }
 0x463   :  { %1286 = vst.msk [vmem:[#allocation2] sm:$0x1] %vm1285_vm6, %v1284_v9 }
 0x464   :  { %2210 = shalt.err (!%p2207_p4)
}
 0x465   :  { %s2211_s15 = scalar_lea.hbm %s3214_s5, 32 }
 0x466   :  { %p2212_p5 = scmp.ne.s32.totalorder %s3214_s5, %s2211_s15  ;;  %p2215_p6 = scmp.lt.u32.totalorder %s2211_s15, %s3214_s5 }
 0x468   :  { %p2217_p7 = pnand %p2215_p6, %p2212_p5 }
 0x46a   :  { %2220 = shalt.err (!%p2217_p7)
}
 0x46b   :  { %1807 = dma.vmem_to_hbm [thread:$0]  %s1805_s4, 32, %s3214_s5, [#allocation3]  }
 0x46c   :  { %2221 = dma.done.wait [#allocation3], 32  }
 0x46d   :  { %2222 = vsyncadd [#allocation3], 4294967264 }
 0x46e   :  { %1811 = vsyncpa [#allocation3], 1 }

</bundles_post_ra>
